<compile_context>
chip_gen: v5e
topology: v5e:2x2
jax: 0.10.0
libtpu: 0.0.40
codegen_flags: <defaults>
</compile_context>

<pallas_src>
import jax
import jax.numpy as jnp
from jax.experimental import pallas as pl
from jax.experimental.pallas import tpu as pltpu


def _sigmoid_mul_kernel(g_ref, x_ref, o_ref):
    # g_ref: (NC, 1)  gate values (pre-sigmoid)
    # x_ref: (NC, HW) feature-map rows
    # Upcast the tiny gate to f32 for the sigmoid (576 values; required on
    # v5e which has no bf16 EUP/VPU, and avoids bf16 accuracy loss elsewhere).
    gate = jax.nn.sigmoid(g_ref[...].astype(jnp.float32))        # EUP, (NC, 1)
    x = x_ref[...].astype(jnp.float32)                           # VPU
    o_ref[...] = (gate * x).astype(o_ref.dtype)                  # broadcast-mul


def sigmoid_mul(x159, x155):
    """sigmoid(x159) * x155 with NCHW inputs, x159 of shape (N, C, 1, 1)."""
    N, C, H, W = x155.shape
    assert x159.shape == (N, C, 1, 1)
    NC = N * C
    HW = H * W

    x2d = x155.reshape(NC, HW)     # contiguous: metadata-only reshape
    g2d = x159.reshape(NC, 1)

    out2d = pl.pallas_call(
        _sigmoid_mul_kernel,
        out_shape=jax.ShapeDtypeStruct((NC, HW), x155.dtype),
        in_specs=[
            pl.BlockSpec(memory_space=pltpu.MemorySpace.VMEM),
            pl.BlockSpec(memory_space=pltpu.MemorySpace.VMEM),
        ],
        out_specs=pl.BlockSpec(memory_space=pltpu.MemorySpace.VMEM),
    )(g2d, x2d)

    return out2d.reshape(N, C, H, W)


if __name__ == "__main__":
    # Shapes implied by the module: x155 (1, 576, 14, 14), x159 (1, 576, 1, 1)
    key = jax.random.PRNGKey(0)
    k1, k2 = jax.random.split(key)
    x155 = jax.random.normal(k1, (1, 576, 14, 14), dtype=jnp.float32)
    x159 = jax.random.normal(k2, (1, 576, 1, 1), dtype=jnp.float32)

    out = sigmoid_mul(x159, x155)
    out = jax.block_until_ready(out)

    # Reference check in plain JAX
    ref = jax.nn.sigmoid(x159) * x155
    assert out.shape == (1, 576, 14, 14)
    assert jnp.allclose(out, ref, atol=1e-6, rtol=1e-6)

    print("KERNEL_OK")
</pallas_src>

<mosaic_0001>
module attributes {stable_mosaic.version = 11 : i64} {
  func.func @_sigmoid_mul_kernel(%arg0: memref<576x1xf32, #tpu.memory_space<vmem>>, %arg1: memref<576x196xf32, #tpu.memory_space<vmem>>, %arg2: memref<576x196xf32, #tpu.memory_space<vmem>>) attributes {dimension_semantics = [], scalar_prefetch = 0 : i64, scratch_operands = 0 : i64, tpu.core_type = #tpu.core_type<tc>} {
    %c0 = arith.constant 0 : index
    %c0_0 = arith.constant 0 : index
    %0 = vector.load %arg0[%c0, %c0_0] : memref<576x1xf32, #tpu.memory_space<vmem>>, vector<576x1xf32>
    %1 = arith.negf %0 : vector<576x1xf32>
    %2 = math.exp %1 : vector<576x1xf32>
    %cst = arith.constant 1.000000e+00 : f32
    %3 = vector.broadcast %cst : f32 to vector<576x1xf32>
    %4 = arith.addf %3, %2 : vector<576x1xf32>
    %5 = arith.divf %3, %4 : vector<576x1xf32>
    %c0_1 = arith.constant 0 : index
    %c0_2 = arith.constant 0 : index
    %6 = vector.load %arg1[%c0_1, %c0_2] : memref<576x196xf32, #tpu.memory_space<vmem>>, vector<576x196xf32>
    %7 = vector.broadcast %5 : vector<576x1xf32> to vector<576x196xf32>
    %8 = arith.mulf %7, %6 : vector<576x196xf32>
    %c0_3 = arith.constant 0 : index
    %c0_4 = arith.constant 0 : index
    %9 = vector.load %arg2[%c0_3, %c0_4] : memref<576x196xf32, #tpu.memory_space<vmem>>, vector<576x196xf32>
    tpu.vector_store %arg2[%c0_3, %c0_4], %8 {strides = array<i32>} : memref<576x196xf32, #tpu.memory_space<vmem>>, vector<576x196xf32>,
    return
  }
}

</mosaic_0001>

<bundles_post_ra>
// kernel: tpu_custom_call.1
= control target key start
LH: loop header
LB: loop body
LE: loop exit
PB: predicated region body
PF: predicated region fallthrough
CT: control target
= control target key end

     0   :  { %v2612_v0 = vmov 0   ;;  %s5560_s0 = inlined_call_operand.vmem [shape: f32[576,1], index: 0, kind: input, shape index: {}]   ;;  %s5561_s1 = inlined_call_operand.vmem [shape: f32[576,196], index: 1, kind: input, shape index: {}]   ;;  %s5562_s2 = inlined_call_operand.vmem [shape: f32[576,196], index: 2, kind: output, shape index: {}]  }
   0x1   :  { %2323 = vset.pattern.permute.xlu2 %v2612_v0  ;;  %2322 = vset.pattern.permute.xlu1 %v2612_v0  ;;  %v15_v1 = vld [vmem:[%s5560_s0 + $0x20] sm:$0xff]  ;;  %v13_v2 = vld [vmem:[%s5560_s0 + $0x10] sm:$0xff]  ;;  %v16_v7 = vld [vmem:[%s5560_s0 + $0x28] sm:$0xff] }
   0x2   :  { %v11_v3 = vld [vmem:[%s5560_s0] sm:$0xff]  ;;  %2321 = vset.pattern.permute.xlu0 %v2612_v0  ;;  %v2252_v4 = vmul.f32 -1.442695, %v15_v1  ;;  %v2250_v5 = vmul.f32 -1.442695, %v13_v2  ;;  %v14_v8 = vld [vmem:[%s5560_s0 + $0x18] sm:$0xff] }
   0x3   :  { %v2248_v6 = vmul.f32 -1.442695, %v11_v3  ;;  %v12_v9 = vld [vmem:[%s5560_s0 + $0x8] sm:$0xff]  ;;  %v2253_v10 = vmul.f32 -1.442695, %v16_v7  ;;  %v19_v13 = vld [vmem:[%s5560_s0 + $0x40] sm:$0xff] }
   0x4   :  { %2324 = vpow2.f32 %v2252_v4  ;;  %v2251_v11 = vmul.f32 -1.442695, %v14_v8  ;;  %v2249_v12 = vmul.f32 -1.442695, %v12_v9  ;;  %v18_v14 = vld [vmem:[%s5560_s0 + $0x38] sm:$0xff]  ;;  %v17_v17 = vld [vmem:[%s5560_s0 + $0x30] sm:$0xff] }
   0x5   :  { %2326 = vpow2.f32 %v2250_v5  ;;  %v2256_v15 = vmul.f32 -1.442695, %v19_v13  ;;  %v2255_v16 = vmul.f32 -1.442695, %v18_v14  ;;  %v2254_v23 = vmul.f32 -1.442695, %v17_v17 }
   0x6   :  { %2328 = vpow2.f32 %v2248_v6  ;;  %v22_v25 = vld [vmem:[%s5560_s0 + $0x58] sm:$0xff]  ;;  %v20_v39 = vld [vmem:[%s5560_s0 + $0x48] sm:$0xff] }
   0x7   :  { %2330 = vpow2.f32 %v2253_v10  ;;  %v2674_v35 = vmul.f32 -1.442695, %v22_v25 }
   0x8   :  { %2332 = vpow2.f32 %v2251_v11 }
   0x9   :  { %2334 = vpow2.f32 %v2249_v12 }
   0xa   :  { %v2325_v18 = vpop.eup %2324  ;;  %2336 = vpow2.f32 %v2256_v15 }
   0xb   :  { %v2327_v19 = vpop.eup %2326  ;;  %v2655_v20 = vadd.f32 1.0, %v2325_v18  ;;  %2338 = vpow2.f32 %v2255_v16 }
   0xc   :  { %v2329_v21 = vpop.eup %2328  ;;  %v2657_v22 = vadd.f32 1.0, %v2327_v19 }
   0xd   :  { %v2331_v24 = vpop.eup %2330  ;;  %2340 = vrcp.f32 %v2655_v20  ;;  %v440_v27 = vand.u32 2147483647, %v2655_v20  ;;  %v442_v28 = vand.u32 2147483648, %v2655_v20  ;;  %v2668_v32 = vadd.f32 1.0, %v2329_v21 }
   0xe   :  { %v2333_v26 = vpop.eup %2332  ;;  %2342 = vrcp.f32 %v2657_v22  ;;  %v410_v30 = vand.u32 2147483647, %v2657_v22  ;;  %v412_v31 = vand.u32 2147483648, %v2657_v22  ;;  %v2670_v33 = vadd.f32 1.0, %v2331_v24 }
   0xf   :  { %v2335_v29 = vpop.eup %2334  ;;  %v2672_v34 = vadd.f32 1.0, %v2333_v26  ;;  %2344 = vpow2.f32 %v2254_v23  ;;  %vm436_vm0 = vweird.f32 %v2655_v20  ;;  %vm406_vm1 = vweird.f32 %v2657_v22 }
  0x10   :  { %v2337_v36 = vpop.eup %2336  ;;  %2346 = vrcp.f32 %v2668_v32  ;;  %v382_v37 = vand.u32 2147483648, %v2668_v32  ;;  %vm2680_vm2 = vcmp.eq.f32.partialorder %v440_v27, 8.507059e+37  ;;  %v443_v40 = vor.u32 1.1754944e-38, %v442_v28 }
  0x11   :  { %v2339_v38 = vpop.eup %2338  ;;  %v380_v41 = vand.u32 2147483647, %v2668_v32  ;;  %2348 = vrcp.f32 %v2670_v33  ;;  %v2686_v42 = vadd.f32 1.0, %v2335_v29  ;;  %vm2688_vm3 = vcmp.eq.f32.partialorder %v410_v30, 8.507059e+37 }
  0x12   :  { %v413_v45 = vor.u32 1.1754944e-38, %v412_v31  ;;  %v457_v46 = vand.u32 2147483648, %v2670_v33  ;;  %2350 = vrcp.f32 %v2672_v34  ;;  %vm376_vm4 = vweird.f32 %v2668_v32 }
  0x13   :  { %v2341_v43 = vpop.eup %2340  ;;  %vm451_vm5 = vweird.f32 %v2670_v33  ;;  %v455_v49 = vand.u32 2147483647, %v2670_v33  ;;  %v2699_v51 = vor.u32 1.1754944e-38, %v382_v37  ;;  %v425_v52 = vand.u32 2147483647, %v2672_v34 }
  0x14   :  { %v2343_v47 = vpop.eup %2342  ;;  %v432_v48 = vmul.f32 %v2341_v43, %v2655_v20  ;;  %v427_v53 = vand.u32 2147483648, %v2672_v34  ;;  %vm437_vm6 = vweird.f32 %v2341_v43  ;;  %vm2703_vm7 = vcmp.eq.f32.partialorder %v380_v41, 8.507059e+37 }
  0x15   :  { %v402_v50 = vmul.f32 %v2343_v47, %v2657_v22  ;;  %v2345_v54 = vpop.eup %2344  ;;  %vm421_vm8 = vweird.f32 %v2672_v34  ;;  %2352 = vrcp.f32 %v2686_v42  ;;  %vm407_vm9 = vweird.f32 %v2343_v47  ;;  %vm2719_vm12 = vmor %vm436_vm0, %vm437_vm6 }
  0x16   :  { %v433_v55 = vsub.f32 1.0, %v432_v48  ;;  %v2347_v57 = vpop.eup %2346  ;;  %v458_v59 = vor.u32 1.1754944e-38, %v457_v46  ;;  %vm391_vm10 = vweird.f32 %v2686_v42  ;;  %vm2711_vm11 = vcmp.eq.f32.partialorder %v455_v49, 8.507059e+37  ;;  %vm2732_vm15 = vmor %vm406_vm1, %vm407_vm9 }
  0x17   :  { %v403_v58 = vsub.f32 1.0, %v402_v50  ;;  %v2349_v60 = vpop.eup %2348  ;;  %v372_v62 = vmul.f32 %v2347_v57, %v2668_v32  ;;  %v428_v0 = vor.u32 1.1754944e-38, %v427_v53  ;;  %v395_v1 = vand.u32 2147483647, %v2686_v42 }
  0x18   :  { %v434_v61 = vmul.f32 %v2341_v43, %v433_v55  ;;  %v2351_v2 = vpop.eup %2350  ;;  %vm377_vm13 = vweird.f32 %v2347_v57  ;;  %v447_v5 = vmul.f32 %v2349_v60, %v2670_v33  ;;  %vm2724_vm14 = vcmp.eq.f32.partialorder %v425_v52, 8.507059e+37  ;;  %v21_v33 = vld [vmem:[%s5560_s0 + $0x50] sm:$0xff] }
  0x19   :  { %v404_v4 = vmul.f32 %v2343_v47, %v403_v58  ;;  %v397_v7 = vand.u32 2147483648, %v2686_v42  ;;  %v373_v10 = vsub.f32 1.0, %v372_v62  ;;  %vm452_vm0 = vweird.f32 %v2349_v60  ;;  %vm2750_vm1 = vmor %vm376_vm4, %vm377_vm13 }
  0x1a   :  { %v435_v8 = vadd.f32 %v2341_v43, %v434_v61  ;;  %v417_v11 = vmul.f32 %v2351_v2, %v2672_v34  ;;  %v448_v13 = vsub.f32 1.0, %v447_v5  ;;  %vm422_vm6 = vweird.f32 %v2351_v2  ;;  %v23_v61 = vld [vmem:[%s5560_s0 + $0x60] sm:$0xff] }
  0x1b   :  { %v405_v12 = vadd.f32 %v2343_v47, %v404_v4  ;;  %v2737_v14 = vadd.f32 1.0, %v2337_v36  ;;  %v2353_v15 = vpop.eup %2352  ;;  %v374_v17 = vmul.f32 %v2347_v57, %v373_v10  ;;  %v2741_v19 = vadd.f32 1.0, %v2339_v38  ;;  %vm2769_vm4 = vmor %vm421_vm8, %vm422_vm6 }
  0x1c   :  { %v439_v16 = vsel %vm2719_vm12, %v2341_v43, %v435_v8  ;;  %v418_v18 = vsub.f32 1.0, %v417_v11  ;;  %v449_v23 = vmul.f32 %v2349_v60, %v448_v13  ;;  %v387_v24 = vmul.f32 %v2353_v15, %v2686_v42  ;;  %v25_v42 = vld [vmem:[%s5560_s0 + $0x70] sm:$0xff] }
  0x1d   :  { %v444_v20 = vsel %vm2680_vm2, %v443_v40, %v439_v16  ;;  %v409_v21 = vsel %vm2732_vm15, %v2343_v47, %v405_v12  ;;  %v375_v26 = vadd.f32 %v2347_v57, %v374_v17  ;;  %vm2760_vm2 = vmor %vm451_vm5, %vm452_vm0  ;;  %v2764_v29 = vadd.f32 1.0, %v2345_v54 }
  0x1e   :  { %1617 = vperm.xlu2 %2323, %v444_v20   ;;  %v414_v25 = vsel %vm2688_vm3, %v413_v45, %v409_v21  ;;  %v419_v28 = vmul.f32 %v2351_v2, %v418_v18  ;;  %v450_v30 = vadd.f32 %v2349_v60, %v449_v23  ;;  %v388_v32 = vsub.f32 1.0, %v387_v24  ;;  %v26_v21 = vld [vmem:[%s5560_s0 + $0x78] sm:$0xff] }
  0x1f   :  { %1607 = vperm.xlu1 %2322, %v414_v25   ;;  %vm392_vm3 = vweird.f32 %v2353_v15  ;;  %2354 = vrcp.f32 %v2737_v14  ;;  %v379_v36 = vsel %vm2750_vm1, %v2347_v57, %v375_v26  ;;  %v500_v38 = vand.u32 2147483647, %v2737_v14 }
  0x20   :  { %v420_v37 = vadd.f32 %v2351_v2, %v419_v28  ;;  %v502_v34 = vand.u32 2147483648, %v2737_v14  ;;  %v384_v40 = vsel %vm2703_vm7, %v2699_v51, %v379_v36  ;;  %v454_v41 = vsel %vm2760_vm2, %v2349_v60, %v450_v30  ;;  %vm2794_vm5 = vmor %vm391_vm10, %vm392_vm3  ;;  %v24_v60 = vld [vmem:[%s5560_s0 + $0x68] sm:$0xff] }
  0x21   :  { %v389_v43 = vmul.f32 %v2353_v15, %v388_v32  ;;  %2356 = vrcp.f32 %v2741_v19  ;;  %1597 = vperm.xlu0 %2321, %v384_v40   ;;  %v2258_v46 = vmul.f32 -1.442695, %v21_v33  ;;  %v459_v47 = vsel %vm2711_vm11, %v458_v59, %v454_v41 }
  0x22   :  { %v424_v44 = vsel %vm2769_vm4, %v2351_v2, %v420_v37  ;;  %v398_v49 = vor.u32 1.1754944e-38, %v397_v7  ;;  %v2257_v50 = vmul.f32 -1.442695, %v20_v39  ;;  %vm2802_vm7 = vcmp.eq.f32.partialorder %v395_v1, 8.507059e+37  ;;  %v28_v2 = vld [vmem:[%s5560_s0 + $0x88] sm:$0xff]  ;;  %v31_v37 = vld [vmem:[%s5560_s0 + $0xa0] sm:$0xff] }
  0x23   :  { %v390_v48 = vadd.f32 %v2353_v15, %v389_v43  ;;  %v429_v51 = vsel %vm2724_vm14, %v428_v0, %v424_v44  ;;  %vm496_vm8 = vweird.f32 %v2737_v14  ;;  %2358 = vrcp.f32 %v2764_v29  ;;  %v29_v43 = vld [vmem:[%s5560_s0 + $0x90] sm:$0xff] }
  0x24   :  { %vm2813_vm9 = vcmp.eq.f32.partialorder %v500_v38, 8.507059e+37  ;;  %v503_v56 = vor.u32 1.1754944e-38, %v502_v34  ;;  %2360 = vpow2.f32 %v2674_v35  ;;  %vm481_vm10 = vweird.f32 %v2741_v19  ;;  %v30_v38 = vld [vmem:[%s5560_s0 + $0x98] sm:$0xff] }
  0x25   :  { %v2355_v53 = vpop.eup %2354  ;;  %v394_v54 = vsel %vm2794_vm5, %v2353_v15, %v390_v48  ;;  %v485_v58 = vand.u32 2147483647, %v2741_v19  ;;  %v487_v59 = vand.u32 2147483648, %v2741_v19  ;;  %vm466_vm11 = vweird.f32 %v2764_v29 }
  0x26   :  { %1622 = vperm.xlu2 %2323, %v459_v47   ;;  %v492_v57 = vmul.f32 %v2355_v53, %v2737_v14  ;;  %v399_v35 = vsel %vm2802_vm7, %v398_v49, %v394_v54  ;;  %2362 = vpow2.f32 %v2258_v46  ;;  %v2262_v63 = vmul.f32 -1.442695, %v25_v42  ;;  %v27_v14 = vld [vmem:[%s5560_s0 + $0x80] sm:$0xff] }
  0x27   :  { %v2357_v62 = vpop.eup %2356  ;;  %1612 = vperm.xlu1 %2322, %v429_v51   ;;  %vm497_vm12 = vweird.f32 %v2355_v53  ;;  %2364 = vpow2.f32 %v2257_v50  ;;  %v470_v3 = vand.u32 2147483647, %v2764_v29  ;;  %v2261_v4 = vmul.f32 -1.442695, %v24_v60 }
  0x28   :  { %v493_v0 = vsub.f32 1.0, %v492_v57  ;;  %v477_v1 = vmul.f32 %v2357_v62, %v2741_v19  ;;  %2366 = vpow2.f32 %v2262_v63  ;;  %v2260_v5 = vmul.f32 -1.442695, %v23_v61  ;;  %vm2840_vm14 = vmor %vm496_vm8, %vm497_vm12 }
  0x29   :  { %v2359_v6 = vpop.eup %2358  ;;  %1602 = vperm.xlu0 %2321, %v399_v35   ;;  %vm482_vm13 = vweird.f32 %v2357_v62  ;;  %v472_v9 = vand.u32 2147483648, %v2764_v29  ;;  %vm2844_vm15 = vcmp.eq.f32.partialorder %v485_v58, 8.507059e+37  ;;  %v488_v13 = vor.u32 1.1754944e-38, %v487_v59 }
  0x2a   :  { %v494_v7 = vmul.f32 %v2355_v53, %v493_v0  ;;  %v478_v8 = vsub.f32 1.0, %v477_v1  ;;  %v2361_v10 = vpop.eup %2360  ;;  %v462_v15 = vmul.f32 %v2359_v6, %v2764_v29  ;;  %v2265_v16 = vmul.f32 -1.442695, %v28_v2  ;;  %vm2860_vm0 = vmor %vm481_vm10, %vm482_vm13 }
  0x2b   :  { %v2849_v20 = vadd.f32 1.0, %v2361_v10  ;;  %2368 = vpow2.f32 %v2261_v4  ;;  %vm467_vm6 = vweird.f32 %v2359_v6  ;;  %vm2864_vm1 = vcmp.eq.f32.partialorder %v470_v3, 8.507059e+37 }
  0x2c   :  { %v495_v17 = vadd.f32 %v2355_v53, %v494_v7  ;;  %v479_v18 = vmul.f32 %v2357_v62, %v478_v8  ;;  %v2363_v22 = vpop.eup %2362  ;;  %v463_v24 = vsub.f32 1.0, %v462_v15  ;;  %2370 = vpow2.f32 %v2260_v5  ;;  %vm2886_vm2 = vmor %vm466_vm11, %vm467_vm6 }
  0x2d   :  { %v2365_v26 = vpop.eup %2364  ;;  %v473_v30 = vor.u32 1.1754944e-38, %v472_v9  ;;  %2372 = vrcp.f32 %v2849_v20  ;;  %v2264_v33 = vmul.f32 -1.442695, %v27_v14  ;;  %v2873_v36 = vmul.f32 -1.442695, %v26_v21 }
  0x2e   :  { %v499_v27 = vsel %vm2840_vm14, %v2355_v53, %v495_v17  ;;  %v480_v28 = vadd.f32 %v2357_v62, %v479_v18  ;;  %v2367_v19 = vpop.eup %2366  ;;  %v464_v32 = vmul.f32 %v2359_v6, %v463_v24  ;;  %v2890_v40 = vadd.f32 1.0, %v2363_v22  ;;  %v34_v22 = vld [vmem:[%s5560_s0 + $0xb8] sm:$0xff] }
  0x2f   :  { %v504_v31 = vsel %vm2813_vm9, %v503_v56, %v499_v27  ;;  %v2892_v41 = vadd.f32 1.0, %v2365_v26  ;;  %2374 = vpow2.f32 %v2265_v16  ;;  %v545_v46 = vand.u32 2147483647, %v2849_v20 }
  0x30   :  { %1637 = vperm.xlu2 %2323, %v504_v31   ;;  %v484_v34 = vsel %vm2860_vm0, %v2357_v62, %v480_v28  ;;  %v465_v45 = vadd.f32 %v2359_v6, %v464_v32  ;;  %v2900_v29 = vadd.f32 1.0, %v2367_v19  ;;  %v547_v48 = vand.u32 2147483648, %v2849_v20  ;;  %v36_v28 = vld [vmem:[%s5560_s0 + $0xc8] sm:$0xff] }
  0x31   :  { %v489_v44 = vsel %vm2844_vm15, %v488_v13, %v484_v34  ;;  %v2369_v47 = vpop.eup %2368  ;;  %2376 = vrcp.f32 %v2890_v40  ;;  %v2904_v49 = vmul.f32 -1.442695, %v31_v37  ;;  %v2906_v50 = vmul.f32 -1.442695, %v30_v38  ;;  %v43_v13 = vld [vmem:[%s5560_s0 + $0x100] sm:$0xff] }
  0x32   :  { %1632 = vperm.xlu1 %2322, %v489_v44   ;;  %v2371_v51 = vpop.eup %2370  ;;  %v469_v52 = vsel %vm2886_vm2, %v2359_v6, %v465_v45  ;;  %v530_v42 = vand.u32 2147483647, %v2890_v40  ;;  %2378 = vrcp.f32 %v2892_v41  ;;  %v2912_v53 = vmul.f32 -1.442695, %v29_v43 }
  0x33   :  { %v2373_v54 = vpop.eup %2372  ;;  %v474_v55 = vsel %vm2864_vm1, %v473_v30, %v469_v52  ;;  %v532_v56 = vand.u32 2147483648, %v2890_v40  ;;  %v515_v57 = vand.u32 2147483647, %v2892_v41  ;;  %v517_v58 = vand.u32 2147483648, %v2892_v41 }
  0x34   :  { %1627 = vperm.xlu0 %2321, %v474_v55   ;;  %v537_v59 = vmul.f32 %v2373_v54, %v2849_v20  ;;  %vm541_vm4 = vweird.f32 %v2849_v20  ;;  %vm2921_vm3 = vcmp.eq.f32.partialorder %v545_v46, 8.507059e+37  ;;  %2380 = vrcp.f32 %v2900_v29 }
  0x35   :  { %v2375_v61 = vpop.eup %2374  ;;  %v548_v62 = vor.u32 1.1754944e-38, %v547_v48  ;;  %vm526_vm5 = vweird.f32 %v2890_v40  ;;  %vm511_vm7 = vweird.f32 %v2892_v41  ;;  %v590_v35 = vand.u32 2147483647, %v2900_v29 }
  0x36   :  { %v538_v63 = vsub.f32 1.0, %v537_v59  ;;  %vm542_vm8 = vweird.f32 %v2373_v54  ;;  %vm2929_vm9 = vcmp.eq.f32.partialorder %v530_v42, 8.507059e+37  ;;  %v2933_v1 = vadd.f32 1.0, %v2369_v47 }
  0x37   :  { %v2935_v2 = vadd.f32 1.0, %v2371_v51  ;;  %v2377_v3 = vpop.eup %2376  ;;  %v533_v4 = vor.u32 1.1754944e-38, %v532_v56  ;;  %vm2937_vm10 = vcmp.eq.f32.partialorder %v515_v57, 8.507059e+37  ;;  %v518_v6 = vor.u32 1.1754944e-38, %v517_v58  ;;  %vm2947_vm12 = vmor %vm541_vm4, %vm542_vm8 }
  0x38   :  { %vm586_vm11 = vweird.f32 %v2900_v29  ;;  %v2379_v7 = vpop.eup %2378  ;;  %v539_v8 = vmul.f32 %v2373_v54, %v538_v63  ;;  %v522_v9 = vmul.f32 %v2377_v3, %v2890_v40  ;;  %v592_v10 = vand.u32 2147483648, %v2900_v29 }
  0x39   :  { %2382 = vrcp.f32 %v2933_v1  ;;  %v507_v12 = vmul.f32 %v2379_v7, %v2892_v41  ;;  %vm2952_vm13 = vcmp.eq.f32.partialorder %v590_v35, 8.507059e+37  ;;  %v2956_v15 = vadd.f32 1.0, %v2375_v61 }
  0x3a   :  { %2384 = vpow2.f32 %v2264_v33  ;;  %v2381_v16 = vpop.eup %2380  ;;  %v540_v17 = vadd.f32 %v2373_v54, %v539_v8  ;;  %v523_v18 = vsub.f32 1.0, %v522_v9  ;;  %vm527_vm14 = vweird.f32 %v2377_v3  ;;  %v32_v9 = vld [vmem:[%s5560_s0 + $0xa8] sm:$0xff]  ;;  %v35_v33 = vld [vmem:[%s5560_s0 + $0xc0] sm:$0xff] }
  0x3b   :  { %2386 = vrcp.f32 %v2935_v2  ;;  %v508_v20 = vsub.f32 1.0, %v507_v12  ;;  %vm512_vm15 = vweird.f32 %v2379_v7  ;;  %v582_v14 = vmul.f32 %v2381_v16, %v2900_v29  ;;  %vm2971_vm0 = vmor %vm526_vm5, %vm527_vm14 }
  0x3c   :  { %v575_v21 = vand.u32 2147483647, %v2933_v1  ;;  %v544_v23 = vsel %vm2947_vm12, %v2373_v54, %v540_v17  ;;  %v524_v24 = vmul.f32 %v2377_v3, %v523_v18  ;;  %v593_v25 = vor.u32 1.1754944e-38, %v592_v10  ;;  %vm2978_vm1 = vmor %vm511_vm7, %vm512_vm15 }
  0x3d   :  { %v577_v26 = vand.u32 2147483648, %v2933_v1  ;;  %v549_v27 = vsel %vm2921_vm3, %v548_v62, %v544_v23  ;;  %v509_v30 = vmul.f32 %v2379_v7, %v508_v20  ;;  %v583_v19 = vsub.f32 1.0, %v582_v14 }
  0x3e   :  { %vm587_vm6 = vweird.f32 %v2381_v16  ;;  %1652 = vperm.xlu2 %2323, %v549_v27   ;;  %v525_v32 = vadd.f32 %v2377_v3, %v524_v24  ;;  %vm571_vm2 = vweird.f32 %v2933_v1  ;;  %2388 = vrcp.f32 %v2956_v15 }
  0x3f   :  { %v2383_v31 = vpop.eup %2382  ;;  %v2984_v37 = vmul.f32 -1.442695, %v34_v22  ;;  %v510_v34 = vadd.f32 %v2379_v7, %v509_v30  ;;  %v584_v39 = vmul.f32 %v2381_v16, %v583_v19  ;;  %vm2987_vm4 = vcmp.eq.f32.partialorder %v575_v21, 8.507059e+37  ;;  %vm2996_vm3 = vmor %vm586_vm11, %vm587_vm6 }
  0x40   :  { %v2385_v38 = vpop.eup %2384  ;;  %v567_v40 = vmul.f32 %v2383_v31, %v2933_v1  ;;  %v529_v44 = vsel %vm2971_vm0, %v2377_v3, %v525_v32  ;;  %vm572_vm5 = vweird.f32 %v2383_v31  ;;  %v578_v46 = vor.u32 1.1754944e-38, %v577_v26  ;;  %v33_v1 = vld [vmem:[%s5560_s0 + $0xb0] sm:$0xff] }
  0x41   :  { %v2387_v41 = vpop.eup %2386  ;;  %v560_v47 = vand.u32 2147483647, %v2935_v2  ;;  %v534_v48 = vsel %vm2929_vm9, %v533_v4, %v529_v44  ;;  %v514_v51 = vsel %vm2978_vm1, %v2379_v7, %v510_v34  ;;  %v585_v52 = vadd.f32 %v2381_v16, %v584_v39  ;;  %vm3020_vm9 = vmor %vm571_vm2, %vm572_vm5 }
  0x42   :  { %v568_v42 = vsub.f32 1.0, %v567_v40  ;;  %1647 = vperm.xlu1 %2322, %v534_v48   ;;  %v519_v29 = vsel %vm2937_vm10, %v518_v6, %v514_v51  ;;  %v552_v54 = vmul.f32 %v2387_v41, %v2935_v2  ;;  %vm556_vm7 = vweird.f32 %v2935_v2 }
  0x43   :  { %v562_v55 = vand.u32 2147483648, %v2935_v2  ;;  %1642 = vperm.xlu0 %2321, %v519_v29   ;;  %v589_v56 = vsel %vm2996_vm3, %v2381_v16, %v585_v52  ;;  %vm631_vm8 = vweird.f32 %v2956_v15  ;;  %v3013_v58 = vadd.f32 1.0, %v2385_v38 }
  0x44   :  { %v569_v57 = vmul.f32 %v2383_v31, %v568_v42  ;;  %v2389_v59 = vpop.eup %2388  ;;  %v594_v60 = vsel %vm2952_vm13, %v593_v25, %v589_v56  ;;  %v553_v62 = vsub.f32 1.0, %v552_v54  ;;  %vm557_vm10 = vweird.f32 %v2387_v41 }
  0x45   :  { %2390 = vpow2.f32 %v2873_v36  ;;  %vm3025_vm11 = vcmp.eq.f32.partialorder %v560_v47, 8.507059e+37  ;;  %v627_v0 = vmul.f32 %v2389_v59, %v2956_v15  ;;  %v635_v3 = vand.u32 2147483647, %v2956_v15  ;;  %vm3040_vm12 = vmor %vm556_vm7, %vm557_vm10 }
  0x46   :  { %v570_v35 = vadd.f32 %v2383_v31, %v569_v57  ;;  %1667 = vperm.xlu2 %2323, %v594_v60   ;;  %v554_v4 = vmul.f32 %v2387_v41, %v553_v62  ;;  %v563_v5 = vor.u32 1.1754944e-38, %v562_v55  ;;  %v637_v6 = vand.u32 2147483648, %v2956_v15 }
  0x47   :  { %2392 = vrcp.f32 %v3013_v58  ;;  %v628_v8 = vsub.f32 1.0, %v627_v0  ;;  %vm632_vm13 = vweird.f32 %v2389_v59  ;;  %v2270_v12 = vmul.f32 -1.442695, %v33_v1 }
  0x48   :  { %v574_v36 = vsel %vm3020_vm9, %v2383_v31, %v570_v35  ;;  %2394 = vpow2.f32 %v2904_v49  ;;  %v555_v11 = vadd.f32 %v2387_v41, %v554_v4  ;;  %vm3051_vm14 = vcmp.eq.f32.partialorder %v635_v3, 8.507059e+37  ;;  %v37_v49 = vld [vmem:[%s5560_s0 + $0xd0] sm:$0xff]  ;;  %vm3063_vm15 = vmor %vm631_vm8, %vm632_vm13 }
  0x49   :  { %v579_v10 = vsel %vm2987_vm4, %v578_v46, %v574_v36  ;;  %2396 = vpow2.f32 %v2906_v50  ;;  %v629_v2 = vmul.f32 %v2389_v59, %v628_v8  ;;  %v638_v18 = vor.u32 1.1754944e-38, %v637_v6 }
  0x4a   :  { %2398 = vpow2.f32 %v2912_v53  ;;  %1662 = vperm.xlu1 %2322, %v579_v10   ;;  %v559_v17 = vsel %vm3040_vm12, %v2387_v41, %v555_v11  ;;  %v620_v20 = vand.u32 2147483647, %v3013_v58  ;;  %v2269_v14 = vmul.f32 -1.442695, %v32_v9 }
  0x4b   :  { %v2391_v16 = vpop.eup %2390  ;;  %v564_v53 = vsel %vm3025_vm11, %v563_v5, %v559_v17  ;;  %v630_v21 = vadd.f32 %v2389_v59, %v629_v2  ;;  %2400 = vpow2.f32 %v2984_v37  ;;  %vm616_vm0 = vweird.f32 %v3013_v58 }
  0x4c   :  { %v3070_v22 = vadd.f32 1.0, %v2391_v16  ;;  %1657 = vperm.xlu0 %2321, %v564_v53   ;;  %2402 = vpow2.f32 %v2270_v12  ;;  %v2274_v15 = vmul.f32 -1.442695, %v37_v49  ;;  %v622_v27 = vand.u32 2147483648, %v3013_v58 }
  0x4d   :  { %v2393_v23 = vpop.eup %2392  ;;  %v634_v25 = vsel %vm3063_vm15, %v2389_v59, %v630_v21  ;;  %vm3084_vm6 = vcmp.eq.f32.partialorder %v620_v20, 8.507059e+37  ;;  %v2273_v41 = vmul.f32 -1.442695, %v36_v28  ;;  %v3100_v47 = vmul.f32 -1.442695, %v35_v33 }
  0x4e   :  { %v2395_v24 = vpop.eup %2394  ;;  %v612_v26 = vmul.f32 %v2393_v23, %v3013_v58  ;;  %2404 = vrcp.f32 %v3070_v22  ;;  %v639_v19 = vsel %vm3051_vm14, %v638_v18, %v634_v25  ;;  %v605_v32 = vand.u32 2147483647, %v3070_v22 }
  0x4f   :  { %v2397_v30 = vpop.eup %2396  ;;  %2406 = vpow2.f32 %v2269_v14  ;;  %1682 = vperm.xlu2 %2323, %v639_v19   ;;  %vm617_vm1 = vweird.f32 %v2393_v23  ;;  %v3092_v34 = vadd.f32 1.0, %v2395_v24  ;;  %v607_v40 = vand.u32 2147483648, %v3070_v22 }
  0x50   :  { %v2399_v37 = vpop.eup %2398  ;;  %v613_v38 = vsub.f32 1.0, %v612_v26  ;;  %v3094_v39 = vadd.f32 1.0, %v2397_v30  ;;  %2408 = vpow2.f32 %v2274_v15  ;;  %v623_v46 = vor.u32 1.1754944e-38, %v622_v27  ;;  %vm3104_vm2 = vmor %vm616_vm0, %vm617_vm1 }
  0x51   :  { %v3097_v43 = vadd.f32 1.0, %v2399_v37  ;;  %v2401_v44 = vpop.eup %2400  ;;  %2410 = vrcp.f32 %v3092_v34  ;;  %vm601_vm4 = vweird.f32 %v3070_v22  ;;  %vm3109_vm3 = vcmp.eq.f32.partialorder %v605_v32, 8.507059e+37 }
  0x52   :  { %v614_v45 = vmul.f32 %v2393_v23, %v613_v38  ;;  %v2403_v48 = vpop.eup %2402  ;;  %v680_v42 = vand.u32 2147483647, %v3092_v34  ;;  %2412 = vrcp.f32 %v3094_v39  ;;  %v682_v55 = vand.u32 2147483648, %v3092_v34 }
  0x53   :  { %v665_v56 = vand.u32 2147483647, %v3094_v39  ;;  %2414 = vrcp.f32 %v3097_v43  ;;  %v608_v59 = vor.u32 1.1754944e-38, %v607_v40  ;;  %v667_v60 = vand.u32 2147483648, %v3094_v39 }
  0x54   :  { %v2405_v29 = vpop.eup %2404  ;;  %v615_v54 = vadd.f32 %v2393_v23, %v614_v45  ;;  %2416 = vpow2.f32 %v2273_v41  ;;  %vm676_vm5 = vweird.f32 %v3092_v34  ;;  %vm661_vm7 = vweird.f32 %v3094_v39 }
  0x55   :  { %v2407_v57 = vpop.eup %2406  ;;  %v597_v58 = vmul.f32 %v2405_v29, %v3070_v22  ;;  %v650_v62 = vand.u32 2147483647, %v3097_v43  ;;  %vm602_vm8 = vweird.f32 %v2405_v29  ;;  %v3127_v3 = vadd.f32 1.0, %v2401_v44 }
  0x56   :  { %v619_v61 = vsel %vm3104_vm2, %v2393_v23, %v615_v54  ;;  %v2409_v35 = vpop.eup %2408  ;;  %vm3129_vm9 = vcmp.eq.f32.partialorder %v680_v42, 8.507059e+37  ;;  %v683_v5 = vor.u32 1.1754944e-38, %v682_v55  ;;  %vm3133_vm10 = vcmp.eq.f32.partialorder %v665_v56, 8.507059e+37  ;;  %vm3143_vm12 = vmor %vm601_vm4, %vm602_vm8 }
  0x57   :  { %v624_v63 = vsel %vm3084_vm6, %v623_v46, %v619_v61  ;;  %v598_v0 = vsub.f32 1.0, %v597_v58  ;;  %v2411_v1 = vpop.eup %2410  ;;  %v3137_v36 = vadd.f32 1.0, %v2403_v48  ;;  %v668_v10 = vor.u32 1.1754944e-38, %v667_v60 }
  0x58   :  { %1677 = vperm.xlu1 %2322, %v624_v63   ;;  %v2413_v7 = vpop.eup %2412  ;;  %v672_v9 = vmul.f32 %v2411_v1, %v3092_v34  ;;  %vm646_vm11 = vweird.f32 %v3097_v43  ;;  %vm3148_vm13 = vcmp.eq.f32.partialorder %v650_v62, 8.507059e+37  ;;  %v652_v49 = vand.u32 2147483648, %v3097_v43 }
  0x59   :  { %v599_v8 = vmul.f32 %v2405_v29, %v598_v0  ;;  %v2415_v11 = vpop.eup %2414  ;;  %v657_v2 = vmul.f32 %v2413_v7, %v3094_v39  ;;  %2418 = vrcp.f32 %v3127_v3  ;;  %vm677_vm14 = vweird.f32 %v2411_v1 }
  0x5a   :  { %v2417_v16 = vpop.eup %2416  ;;  %v673_v50 = vsub.f32 1.0, %v672_v9  ;;  %v642_v18 = vmul.f32 %v2415_v11, %v3097_v43  ;;  %vm662_vm15 = vweird.f32 %v2413_v7  ;;  %2420 = vrcp.f32 %v3137_v36  ;;  %vm3164_vm6 = vmor %vm676_vm5, %vm677_vm14 }
  0x5b   :  { %v600_v17 = vadd.f32 %v2405_v29, %v599_v8  ;;  %v658_v20 = vsub.f32 1.0, %v657_v2  ;;  %v3156_v14 = vadd.f32 1.0, %v2407_v57  ;;  %vm647_vm0 = vweird.f32 %v2415_v11  ;;  %vm3172_vm1 = vmor %vm661_vm7, %vm662_vm15  ;;  %v38_v2 = vld [vmem:[%s5560_s0 + $0xd8] sm:$0xff] }
  0x5c   :  { %v674_v21 = vmul.f32 %v2411_v1, %v673_v50  ;;  %v643_v22 = vsub.f32 1.0, %v642_v18  ;;  %v653_v25 = vor.u32 1.1754944e-38, %v652_v49  ;;  %v3168_v26 = vadd.f32 1.0, %v2409_v35  ;;  %vm3180_vm4 = vmor %vm646_vm11, %vm647_vm0 }
  0x5d   :  { %v604_v53 = vsel %vm3143_vm12, %v2405_v29, %v600_v17  ;;  %v659_v24 = vmul.f32 %v2413_v7, %v658_v20  ;;  %vm721_vm2 = vweird.f32 %v3127_v3  ;;  %v725_v19 = vand.u32 2147483647, %v3127_v3 }
  0x5e   :  { %v609_v23 = vsel %vm3109_vm3, %v608_v59, %v604_v53  ;;  %v675_v27 = vadd.f32 %v2411_v1, %v674_v21  ;;  %v644_v30 = vmul.f32 %v2415_v11, %v643_v22  ;;  %v727_v37 = vand.u32 2147483648, %v3127_v3 }
  0x5f   :  { %1672 = vperm.xlu0 %2321, %v609_v23   ;;  %v2419_v31 = vpop.eup %2418  ;;  %v660_v32 = vadd.f32 %v2413_v7, %v659_v24  ;;  %vm706_vm3 = vweird.f32 %v3137_v36  ;;  %2422 = vrcp.f32 %v3156_v14  ;;  %v710_v40 = vand.u32 2147483647, %v3137_v36 }
  0x60   :  { %v679_v38 = vsel %vm3164_vm6, %v2411_v1, %v675_v27  ;;  %v645_v34 = vadd.f32 %v2415_v11, %v644_v30  ;;  %v717_v39 = vmul.f32 %v2419_v31, %v3127_v3  ;;  %v2421_v41 = vpop.eup %2420  ;;  %vm722_vm5 = vweird.f32 %v2419_v31  ;;  %v40_v1 = vld [vmem:[%s5560_s0 + $0xe8] sm:$0xff] }
  0x61   :  { %v684_v43 = vsel %vm3129_vm9, %v683_v5, %v679_v38  ;;  %v664_v44 = vsel %vm3172_vm1, %v2413_v7, %v660_v32  ;;  %v712_v45 = vand.u32 2147483648, %v3137_v36  ;;  %v702_v52 = vmul.f32 %v2421_v41, %v3137_v36  ;;  %vm3212_vm9 = vmor %vm721_vm2, %vm722_vm5  ;;  %v39_v7 = vld [vmem:[%s5560_s0 + $0xe0] sm:$0xff] }
  0x62   :  { %1697 = vperm.xlu2 %2323, %v684_v43   ;;  %v669_v46 = vsel %vm3133_vm10, %v668_v10, %v664_v44  ;;  %v649_v48 = vsel %vm3180_vm4, %v2415_v11, %v645_v34  ;;  %v718_v51 = vsub.f32 1.0, %v717_v39  ;;  %vm3203_vm7 = vcmp.eq.f32.partialorder %v725_v19, 8.507059e+37  ;;  %v46_v43 = vld [vmem:[%s5560_s0 + $0x118] sm:$0xff] }
  0x63   :  { %1692 = vperm.xlu1 %2322, %v669_v46   ;;  %v654_v42 = vsel %vm3148_vm13, %v653_v25, %v649_v48  ;;  %v728_v54 = vor.u32 1.1754944e-38, %v727_v37  ;;  %v695_v55 = vand.u32 2147483647, %v3156_v14  ;;  %v703_v57 = vsub.f32 1.0, %v702_v52  ;;  %v45_v52 = vld [vmem:[%s5560_s0 + $0x110] sm:$0xff] }
  0x64   :  { %v719_v56 = vmul.f32 %v2419_v31, %v718_v51  ;;  %vm707_vm8 = vweird.f32 %v2421_v41  ;;  %2424 = vrcp.f32 %v3168_v26  ;;  %vm3216_vm10 = vcmp.eq.f32.partialorder %v710_v40, 8.507059e+37 }
  0x65   :  { %v2423_v58 = vpop.eup %2422  ;;  %vm691_vm11 = vweird.f32 %v3156_v14  ;;  %v697_v61 = vand.u32 2147483648, %v3156_v14  ;;  %v3222_v62 = vadd.f32 1.0, %v2417_v16  ;;  %v704_v63 = vmul.f32 %v2421_v41, %v703_v57  ;;  %vm3230_vm12 = vmor %vm706_vm3, %vm707_vm8 }
  0x66   :  { %v720_v35 = vadd.f32 %v2419_v31, %v719_v56  ;;  %v713_v0 = vor.u32 1.1754944e-38, %v712_v45  ;;  %v687_v3 = vmul.f32 %v2423_v58, %v3156_v14  ;;  %vm3234_vm13 = vcmp.eq.f32.partialorder %v695_v55, 8.507059e+37  ;;  %v41_v14 = vld [vmem:[%s5560_s0 + $0xf0] sm:$0xff] }
  0x67   :  { %1687 = vperm.xlu0 %2321, %v654_v42   ;;  %vm766_vm14 = vweird.f32 %v3168_v26  ;;  %v772_v6 = vand.u32 2147483648, %v3168_v26  ;;  %2426 = vrcp.f32 %v3222_v62  ;;  %v705_v8 = vadd.f32 %v2421_v41, %v704_v63  ;;  %v44_v42 = vld [vmem:[%s5560_s0 + $0x108] sm:$0xff] }
  0x68   :  { %v724_v36 = vsel %vm3212_vm9, %v2419_v31, %v720_v35  ;;  %v688_v9 = vsub.f32 1.0, %v687_v3  ;;  %vm692_vm15 = vweird.f32 %v2423_v58  ;;  %v698_v11 = vor.u32 1.1754944e-38, %v697_v61 }
  0x69   :  { %v729_v10 = vsel %vm3203_vm7, %v728_v54, %v724_v36  ;;  %2428 = vpow2.f32 %v3100_v47  ;;  %v2277_v12 = vmul.f32 -1.442695, %v40_v1  ;;  %v709_v16 = vsel %vm3230_vm12, %v2421_v41, %v705_v8  ;;  %v42_v47 = vld [vmem:[%s5560_s0 + $0xf8] sm:$0xff]  ;;  %vm3266_vm0 = vmor %vm691_vm11, %vm692_vm15 }
  0x6a   :  { %v2425_v49 = vpop.eup %2424  ;;  %1712 = vperm.xlu2 %2323, %v729_v10   ;;  %v689_v17 = vmul.f32 %v2423_v58, %v688_v9  ;;  %v770_v50 = vand.u32 2147483647, %v3168_v26  ;;  %v2276_v18 = vmul.f32 -1.442695, %v39_v7  ;;  %v714_v20 = vsel %vm3216_vm10, %v713_v0, %v709_v16 }
  0x6b   :  { %v762_v21 = vmul.f32 %v2425_v49, %v3168_v26  ;;  %v773_v22 = vor.u32 1.1754944e-38, %v772_v6  ;;  %v755_v23 = vand.u32 2147483647, %v3222_v62  ;;  %1707 = vperm.xlu1 %2322, %v714_v20   ;;  %2430 = vpow2.f32 %v2277_v12 }
  0x6c   :  { %v690_v15 = vadd.f32 %v2423_v58, %v689_v17  ;;  %v2275_v24 = vmul.f32 -1.442695, %v38_v2  ;;  %v2280_v25 = vmul.f32 -1.442695, %v43_v13  ;;  %vm767_vm6 = vweird.f32 %v2425_v49 }
  0x6d   :  { %v2427_v27 = vpop.eup %2426  ;;  %v763_v28 = vsub.f32 1.0, %v762_v21  ;;  %2432 = vpow2.f32 %v2276_v18  ;;  %v2279_v30 = vmul.f32 -1.442695, %v42_v47  ;;  %v757_v32 = vand.u32 2147483648, %v3222_v62  ;;  %vm3284_vm2 = vmor %vm766_vm14, %vm767_vm6 }
  0x6e   :  { %v694_v19 = vsel %vm3266_vm0, %v2423_v58, %v690_v15  ;;  %v747_v31 = vmul.f32 %v2427_v27, %v3222_v62  ;;  %2434 = vpow2.f32 %v2275_v24  ;;  %vm751_vm1 = vweird.f32 %v3222_v62 }
  0x6f   :  { %v2429_v33 = vpop.eup %2428  ;;  %v699_v37 = vsel %vm3234_vm13, %v698_v11, %v694_v19  ;;  %v764_v38 = vmul.f32 %v2425_v49, %v763_v28  ;;  %2436 = vpow2.f32 %v2280_v25  ;;  %vm752_vm4 = vweird.f32 %v2427_v27 }
  0x70   :  { %1702 = vperm.xlu0 %2321, %v699_v37   ;;  %v748_v39 = vsub.f32 1.0, %v747_v31  ;;  %v3288_v40 = vadd.f32 1.0, %v2429_v33  ;;  %v2278_v41 = vmul.f32 -1.442695, %v41_v14  ;;  %vm3293_vm3 = vcmp.eq.f32.partialorder %v770_v50, 8.507059e+37  ;;  %vm3313_vm7 = vmor %vm751_vm1, %vm752_vm4 }
  0x71   :  { %v765_v44 = vadd.f32 %v2425_v49, %v764_v38  ;;  %2438 = vpow2.f32 %v2279_v30  ;;  %v2431_v26 = vpop.eup %2430  ;;  %vm3297_vm5 = vcmp.eq.f32.partialorder %v755_v23, 8.507059e+37  ;;  %v758_v51 = vor.u32 1.1754944e-38, %v757_v32  ;;  %v49_v23 = vld [vmem:[%s5560_s0 + $0x130] sm:$0xff] }
  0x72   :  { %v749_v46 = vmul.f32 %v2427_v27, %v748_v39  ;;  %2440 = vrcp.f32 %v3288_v40  ;;  %v740_v56 = vand.u32 2147483647, %v3288_v40  ;;  %v3318_v57 = vadd.f32 1.0, %v2431_v26 }
  0x73   :  { %v2433_v29 = vpop.eup %2432  ;;  %v769_v54 = vsel %vm3284_vm2, %v2425_v49, %v765_v44  ;;  %v2283_v58 = vmul.f32 -1.442695, %v46_v43  ;;  %2442 = vpow2.f32 %v2278_v41  ;;  %v742_v62 = vand.u32 2147483648, %v3288_v40 }
  0x74   :  { %v2435_v59 = vpop.eup %2434  ;;  %v774_v60 = vsel %vm3293_vm3, %v773_v22, %v769_v54  ;;  %v750_v61 = vadd.f32 %v2427_v27, %v749_v46  ;;  %v3322_v35 = vadd.f32 1.0, %v2433_v29  ;;  %2444 = vrcp.f32 %v3318_v57 }
  0x75   :  { %v2437_v63 = vpop.eup %2436  ;;  %1727 = vperm.xlu2 %2323, %v774_v60   ;;  %v3326_v0 = vmul.f32 -1.442695, %v45_v52  ;;  %v3328_v3 = vmul.f32 -1.442695, %v44_v42  ;;  %v815_v4 = vand.u32 2147483647, %v3318_v57  ;;  %vm736_vm8 = vweird.f32 %v3288_v40 }
  0x76   :  { %v754_v1 = vsel %vm3313_vm7, %v2427_v27, %v750_v61  ;;  %v817_v5 = vand.u32 2147483648, %v3318_v57  ;;  %2446 = vrcp.f32 %v3322_v35  ;;  %vm3338_vm9 = vcmp.eq.f32.partialorder %v740_v56, 8.507059e+37  ;;  %v51_v42 = vld [vmem:[%s5560_s0 + $0x140] sm:$0xff] }
  0x77   :  { %v2439_v6 = vpop.eup %2438  ;;  %v759_v7 = vsel %vm3297_vm5, %v758_v51, %v754_v1  ;;  %2448 = vpow2.f32 %v2283_v58  ;;  %v800_v9 = vand.u32 2147483647, %v3322_v35  ;;  %v802_v10 = vand.u32 2147483648, %v3322_v35 }
  0x78   :  { %v2441_v8 = vpop.eup %2440  ;;  %1722 = vperm.xlu1 %2322, %v759_v7   ;;  %v3344_v11 = vadd.f32 1.0, %v2435_v59  ;;  %v3346_v12 = vadd.f32 1.0, %v2437_v63  ;;  %v743_v13 = vor.u32 1.1754944e-38, %v742_v62  ;;  %vm811_vm10 = vweird.f32 %v3318_v57 }
  0x79   :  { %v732_v2 = vmul.f32 %v2441_v8, %v3288_v40  ;;  %vm796_vm11 = vweird.f32 %v3322_v35  ;;  %v2443_v49 = vpop.eup %2442  ;;  %vm737_vm12 = vweird.f32 %v2441_v8  ;;  %vm3351_vm13 = vcmp.eq.f32.partialorder %v815_v4, 8.507059e+37  ;;  %v50_v4 = vld [vmem:[%s5560_s0 + $0x138] sm:$0xff] }
  0x7a   :  { %v818_v17 = vor.u32 1.1754944e-38, %v817_v5  ;;  %2450 = vrcp.f32 %v3344_v11  ;;  %v3356_v50 = vadd.f32 1.0, %v2439_v6  ;;  %v2445_v18 = vpop.eup %2444  ;;  %v785_v20 = vand.u32 2147483647, %v3344_v11  ;;  %vm3373_vm6 = vmor %vm736_vm8, %vm737_vm12 }
  0x7b   :  { %v733_v47 = vsub.f32 1.0, %v732_v2  ;;  %v787_v53 = vand.u32 2147483648, %v3344_v11  ;;  %2452 = vrcp.f32 %v3346_v12  ;;  %v807_v22 = vmul.f32 %v2445_v18, %v3318_v57 }
  0x7c   :  { %v2447_v21 = vpop.eup %2446  ;;  %vm3362_vm14 = vcmp.eq.f32.partialorder %v800_v9, 8.507059e+37  ;;  %v803_v15 = vor.u32 1.1754944e-38, %v802_v10  ;;  %v860_v24 = vand.u32 2147483647, %v3346_v12  ;;  %vm781_vm15 = vweird.f32 %v3344_v11  ;;  %v1618_v10 = vpop.permute.xlu2 %1617 }
  0x7d   :  { %v2449_v25 = vpop.eup %2448  ;;  %v734_v27 = vmul.f32 %v2441_v8, %v733_v47  ;;  %v792_v28 = vmul.f32 %v2447_v21, %v3322_v35  ;;  %vm856_vm0 = vweird.f32 %v3346_v12  ;;  %v808_v14 = vsub.f32 1.0, %v807_v22  ;;  %v1460_v22 = vld [vmem:[%s5561_s1 + $0x48] sm:$0xff] }
  0x7e   :  { %vm812_vm1 = vweird.f32 %v2445_v18  ;;  %v862_v19 = vand.u32 2147483648, %v3346_v12  ;;  %2454 = vrcp.f32 %v3356_v50  ;;  %vm797_vm2 = vweird.f32 %v2447_v21 }
  0x7f   :  { %v735_v31 = vadd.f32 %v2441_v8, %v734_v27  ;;  %v793_v32 = vsub.f32 1.0, %v792_v28  ;;  %vm3379_vm4 = vcmp.eq.f32.partialorder %v785_v20, 8.507059e+37  ;;  %v788_v37 = vor.u32 1.1754944e-38, %v787_v53  ;;  %vm3396_vm7 = vmor %vm811_vm10, %vm812_vm1  ;;  %v47_v28 = vld [vmem:[%s5560_s0 + $0x120] sm:$0xff] }
  0x80   :  { %v2451_v38 = vpop.eup %2450  ;;  %v809_v34 = vmul.f32 %v2445_v18, %v808_v14  ;;  %vm3383_vm3 = vcmp.eq.f32.partialorder %v860_v24, 8.507059e+37  ;;  %vm841_vm5 = vweird.f32 %v3356_v50  ;;  %v845_v40 = vand.u32 2147483647, %v3356_v50  ;;  %vm3407_vm8 = vmor %vm796_vm11, %vm797_vm2 }
  0x81   :  { %v3389_v41 = vadd.f32 1.0, %v2443_v49  ;;  %v2453_v43 = vpop.eup %2452  ;;  %v739_v44 = vsel %vm3373_vm6, %v2441_v8, %v735_v31  ;;  %v794_v26 = vmul.f32 %v2447_v21, %v793_v32  ;;  %v777_v46 = vmul.f32 %v2451_v38, %v3344_v11 }
  0x82   :  { %v847_v48 = vand.u32 2147483648, %v3356_v50  ;;  %v744_v51 = vsel %vm3338_vm9, %v743_v13, %v739_v44  ;;  %v810_v52 = vadd.f32 %v2445_v18, %v809_v34  ;;  %v852_v29 = vmul.f32 %v2453_v43, %v3346_v12  ;;  %v52_v34 = vld [vmem:[%s5560_s0 + $0x148] sm:$0xff]  ;;  %v1462_v44 = vld [vmem:[%s5561_s1 + $0x58] sm:$0xff] }
  0x83   :  { %v863_v54 = vor.u32 1.1754944e-38, %v862_v19  ;;  %1717 = vperm.xlu0 %2321, %v744_v51   ;;  %v795_v55 = vadd.f32 %v2447_v21, %v794_v26  ;;  %v778_v56 = vsub.f32 1.0, %v777_v46  ;;  %vm782_vm10 = vweird.f32 %v2451_v38 }
  0x84   :  { %v3412_v57 = vadd.f32 1.0, %v2449_v25  ;;  %v2455_v58 = vpop.eup %2454  ;;  %v814_v59 = vsel %vm3396_vm7, %v2445_v18, %v810_v52  ;;  %v853_v60 = vsub.f32 1.0, %v852_v29  ;;  %vm857_vm9 = vweird.f32 %v2453_v43  ;;  %vm3426_vm11 = vmor %vm781_vm15, %vm782_vm10  ;;  %v1623_v45 = vpop.permute.xlu2 %1622 }
  0x85   :  { %2456 = vrcp.f32 %v3389_v41  ;;  %v819_v61 = vsel %vm3351_vm13, %v818_v17, %v814_v59  ;;  %v799_v35 = vsel %vm3407_vm8, %v2447_v21, %v795_v55  ;;  %v779_v63 = vmul.f32 %v2451_v38, %v778_v56  ;;  %vm3434_vm13 = vmor %vm856_vm0, %vm857_vm9  ;;  %v1459_v17 = vld [vmem:[%s5561_s1 + $0x40] sm:$0xff] }
  0x86   :  { %v837_v62 = vmul.f32 %v2455_v58, %v3356_v50  ;;  %1742 = vperm.xlu2 %2323, %v819_v61   ;;  %v804_v1 = vsel %vm3362_vm14, %v803_v15, %v799_v35  ;;  %v854_v5 = vmul.f32 %v2453_v43, %v853_v60  ;;  %vm842_vm12 = vweird.f32 %v2455_v58 }
  0x87   :  { %v830_v6 = vand.u32 2147483647, %v3389_v41  ;;  %1737 = vperm.xlu1 %2322, %v804_v1   ;;  %v780_v7 = vadd.f32 %v2451_v38, %v779_v63  ;;  %v832_v9 = vand.u32 2147483648, %v3389_v41  ;;  %2458 = vrcp.f32 %v3412_v57  ;;  %vm3464_vm1 = vmor %vm841_vm5, %vm842_vm12 }
  0x88   :  { %v838_v8 = vsub.f32 1.0, %v837_v62  ;;  %v855_v11 = vadd.f32 %v2453_v43, %v854_v5  ;;  %vm3440_vm14 = vcmp.eq.f32.partialorder %v845_v40, 8.507059e+37  ;;  %v848_v13 = vor.u32 1.1754944e-38, %v847_v48 }
  0x89   :  { %vm826_vm15 = vweird.f32 %v3389_v41  ;;  %v784_v12 = vsel %vm3426_vm11, %v2451_v38, %v780_v7  ;;  %vm3447_vm0 = vcmp.eq.f32.partialorder %v830_v6, 8.507059e+37  ;;  %vm901_vm6 = vweird.f32 %v3412_v57  ;;  %v55_v6 = vld [vmem:[%s5560_s0 + $0x160] sm:$0xff] }
  0x8a   :  { %v839_v49 = vmul.f32 %v2455_v58, %v838_v8  ;;  %v789_v47 = vsel %vm3379_vm4, %v788_v37, %v784_v12  ;;  %v859_v20 = vsel %vm3434_vm13, %v2453_v43, %v855_v11  ;;  %v905_v21 = vand.u32 2147483647, %v3412_v57  ;;  %v1461_v43 = vld [vmem:[%s5561_s1 + $0x50] sm:$0xff]  ;;  %v1467_v12 = vld [vmem:[%s5561_s1 + $0x80] sm:$0xff] }
  0x8b   :  { %v3455_v18 = vpop.eup %2456  ;;  %2460 = vpow2.f32 %v3326_v0  ;;  %1732 = vperm.xlu0 %2321, %v789_v47   ;;  %v864_v50 = vsel %vm3383_vm3, %v863_v54, %v859_v20  ;;  %v833_v25 = vor.u32 1.1754944e-38, %v832_v9  ;;  %v48_v0 = vld [vmem:[%s5560_s0 + $0x128] sm:$0xff]  ;;  %vm2100_vm4 = vcmask 556032   ;;  %v54_v9 = vld [vmem:[%s5560_s0 + $0x158] sm:$0xff] }
  0x8c   :  { %v840_v15 = vadd.f32 %v2455_v58, %v839_v49  ;;  %v822_v24 = vmul.f32 %v3455_v18, %v3389_v41  ;;  %vm827_vm2 = vweird.f32 %v3455_v18  ;;  %2462 = vpow2.f32 %v3328_v3 }
  0x8d   :  { %v1963_v27 = vmul.f32 %v1618_v10, %v1459_v17  ;;  %v2459_v30 = vpop.eup %2458  ;;  %v1964_v31 = vmul.f32 %v1618_v10, %v1460_v22  ;;  %v2286_v32 = vmul.f32 -1.442695, %v49_v23  ;;  %v907_v3 = vand.u32 2147483648, %v3412_v57  ;;  %vm3515_vm5 = vmor %vm826_vm15, %vm827_vm2 }
  0x8e   :  { %v844_v14 = vsel %vm3464_vm1, %v2455_v58, %v840_v15  ;;  %v823_v19 = vsub.f32 1.0, %v822_v24  ;;  %1757 = vperm.xlu2 %2323, %v864_v50   ;;  %v897_v37 = vmul.f32 %v2459_v30, %v3412_v57  ;;  %v2285_v38 = vmul.f32 -1.442695, %v48_v0 }
  0x8f   :  { %v849_v33 = vsel %vm3440_vm14, %v848_v13, %v844_v14  ;;  %2108 = vst [vmem:[%s5562_s2 + $0x40] sm:$0xff] %v1963_v27  ;;  %vm902_vm3 = vweird.f32 %v2459_v30  ;;  %2464 = vpow2.f32 %v2286_v32  ;;  %v2284_v40 = vmul.f32 -1.442695, %v47_v28 }
  0x90   :  { %1752 = vperm.xlu1 %2322, %v849_v33   ;;  %v824_v39 = vmul.f32 %v3455_v18, %v823_v19  ;;  %2109 = vst.msk [vmem:[%s5562_s2 + $0x48] sm:$0xff] %vm2100_vm4, %v1964_v31  ;;  %v898_v48 = vsub.f32 1.0, %v897_v37  ;;  %2466 = vpow2.f32 %v2285_v38  ;;  %v1965_v51 = vmul.f32 %v1623_v45, %v1461_v43  ;;  %vm3538_vm8 = vmor %vm901_vm6, %vm902_vm3 }
  0x91   :  { %v2461_v26 = vpop.eup %2460  ;;  %v1966_v52 = vmul.f32 %v1623_v45, %v1462_v44  ;;  %2468 = vpow2.f32 %v2284_v40  ;;  %v2289_v55 = vmul.f32 -1.442695, %v52_v34  ;;  %vm3525_vm7 = vcmp.eq.f32.partialorder %v905_v21, 8.507059e+37 }
  0x92   :  { %v825_v29 = vadd.f32 %v3455_v18, %v824_v39  ;;  %v3523_v54 = vadd.f32 1.0, %v2461_v26  ;;  %v2463_v56 = vpop.eup %2462  ;;  %v899_v41 = vmul.f32 %v2459_v30, %v898_v48  ;;  %2110 = vst [vmem:[%s5562_s2 + $0x50] sm:$0xff] %v1965_v51  ;;  %v908_v61 = vor.u32 1.1754944e-38, %v907_v3  ;;  %v1638_v48 = vpop.permute.xlu2 %1637 }
  0x93   :  { %2111 = vst.msk [vmem:[%s5562_s2 + $0x58] sm:$0xff] %vm2100_vm4, %v1966_v52  ;;  %v2288_v35 = vmul.f32 -1.442695, %v51_v42  ;;  %v3550_v57 = vadd.f32 1.0, %v2463_v56  ;;  %v2287_v13 = vmul.f32 -1.442695, %v50_v4 }
  0x94   :  { %v829_v59 = vsel %vm3515_vm5, %v3455_v18, %v825_v29  ;;  %2470 = vrcp.f32 %v3523_v54  ;;  %v900_v62 = vadd.f32 %v2459_v30, %v899_v41  ;;  %v890_v1 = vand.u32 2147483647, %v3523_v54  ;;  %v53_v18 = vld [vmem:[%s5560_s0 + $0x150] sm:$0xff] }
  0x95   :  { %v834_v63 = vsel %vm3447_vm0, %v833_v25, %v829_v59  ;;  %v2465_v5 = vpop.eup %2464  ;;  %2472 = vpow2.f32 %v2289_v55  ;;  %v892_v8 = vand.u32 2147483648, %v3523_v54  ;;  %vm886_vm10 = vweird.f32 %v3523_v54 }
  0x96   :  { %1747 = vperm.xlu0 %2321, %v834_v63   ;;  %v2467_v7 = vpop.eup %2466  ;;  %v904_v36 = vsel %vm3538_vm8, %v2459_v30, %v900_v62  ;;  %2474 = vrcp.f32 %v3550_v57  ;;  %v3568_v2 = vadd.f32 1.0, %v2465_v5  ;;  %vm3570_vm9 = vcmp.eq.f32.partialorder %v890_v1, 8.507059e+37 }
  0x97   :  { %v2469_v10 = vpop.eup %2468  ;;  %v909_v11 = vsel %vm3525_vm7, %v908_v61, %v904_v36  ;;  %v3574_v49 = vadd.f32 1.0, %v2467_v7  ;;  %2476 = vpow2.f32 %v2288_v35  ;;  %v3578_v17 = vmul.f32 -1.442695, %v55_v6 }
  0x98   :  { %1772 = vperm.xlu2 %2323, %v909_v11   ;;  %v3576_v16 = vadd.f32 1.0, %v2469_v10  ;;  %v875_v20 = vand.u32 2147483647, %v3550_v57  ;;  %v877_v53 = vand.u32 2147483648, %v3550_v57  ;;  %2478 = vrcp.f32 %v3568_v2 }
  0x99   :  { %v3586_v21 = vmul.f32 -1.442695, %v54_v9  ;;  %v893_v23 = vor.u32 1.1754944e-38, %v892_v8  ;;  %v950_v50 = vand.u32 2147483647, %v3568_v2  ;;  %v952_v15 = vand.u32 2147483648, %v3568_v2 }
  0x9a   :  { %v2471_v47 = vpop.eup %2470  ;;  %vm871_vm11 = vweird.f32 %v3550_v57  ;;  %2480 = vrcp.f32 %v3574_v49  ;;  %v937_v25 = vand.u32 2147483648, %v3574_v49  ;;  %v3594_v0 = vmul.f32 -1.442695, %v53_v18 }
  0x9b   :  { %v882_v22 = vmul.f32 %v2471_v47, %v3523_v54  ;;  %v2473_v24 = vpop.eup %2472  ;;  %vm887_vm12 = vweird.f32 %v2471_v47  ;;  %v935_v30 = vand.u32 2147483647, %v3574_v49  ;;  %2482 = vrcp.f32 %v3576_v16 }
  0x9c   :  { %v2475_v27 = vpop.eup %2474  ;;  %vm3599_vm13 = vcmp.eq.f32.partialorder %v875_v20, 8.507059e+37  ;;  %v878_v31 = vor.u32 1.1754944e-38, %v877_v53  ;;  %vm946_vm14 = vweird.f32 %v3568_v2  ;;  %vm3604_vm15 = vcmp.eq.f32.partialorder %v950_v50, 8.507059e+37  ;;  %vm3611_vm6 = vmor %vm886_vm10, %vm887_vm12  ;;  %v1468_v53 = vld [vmem:[%s5561_s1 + $0x88] sm:$0xff] }
  0x9d   :  { %v883_v28 = vsub.f32 1.0, %v882_v22  ;;  %v867_v14 = vmul.f32 %v2475_v27, %v3550_v57  ;;  %v2477_v32 = vpop.eup %2476  ;;  %v953_v3 = vor.u32 1.1754944e-38, %v952_v15  ;;  %vm931_vm0 = vweird.f32 %v3574_v49 }
  0x9e   :  { %v2479_v38 = vpop.eup %2478  ;;  %vm872_vm1 = vweird.f32 %v2475_v27  ;;  %v3615_v40 = vor.u32 1.1754944e-38, %v937_v25  ;;  %v3617_v43 = vadd.f32 1.0, %v2473_v24  ;;  %vm3620_vm2 = vcmp.eq.f32.partialorder %v935_v30, 8.507059e+37 }
  0x9f   :  { %v884_v33 = vmul.f32 %v2471_v47, %v883_v28  ;;  %v868_v39 = vsub.f32 1.0, %v867_v14  ;;  %v942_v45 = vmul.f32 %v2479_v38, %v3568_v2  ;;  %v920_v46 = vand.u32 2147483647, %v3576_v16  ;;  %vm3634_vm3 = vmor %vm871_vm11, %vm872_vm1 }
  0xa0   :  { %2484 = vpow2.f32 %v2287_v13  ;;  %v2481_v51 = vpop.eup %2480  ;;  %v922_v42 = vand.u32 2147483648, %v3576_v16  ;;  %v3627_v29 = vadd.f32 1.0, %v2477_v32  ;;  %vm947_vm5 = vweird.f32 %v2479_v38 }
  0xa1   :  { %v885_v44 = vadd.f32 %v2471_v47, %v884_v33  ;;  %v869_v52 = vmul.f32 %v2475_v27, %v868_v39  ;;  %2486 = vrcp.f32 %v3617_v43  ;;  %v2483_v54 = vpop.eup %2482  ;;  %v943_v41 = vsub.f32 1.0, %v942_v45  ;;  %vm3651_vm11 = vmor %vm946_vm14, %vm947_vm5 }
  0xa2   :  { %v927_v58 = vmul.f32 %v2481_v51, %v3574_v49  ;;  %v912_v61 = vmul.f32 %v2483_v54, %v3576_v16  ;;  %vm916_vm7 = vweird.f32 %v3576_v16  ;;  %vm932_vm8 = vweird.f32 %v2481_v51 }
  0xa3   :  { %v889_v55 = vsel %vm3611_vm6, %v2471_v47, %v885_v44  ;;  %v870_v60 = vadd.f32 %v2475_v27, %v869_v52  ;;  %v944_v35 = vmul.f32 %v2479_v38, %v943_v41  ;;  %vm3643_vm10 = vcmp.eq.f32.partialorder %v920_v46, 8.507059e+37  ;;  %vm3662_vm12 = vmor %vm931_vm0, %vm932_vm8  ;;  %v1608_v44 = vpop.permute.xlu1 %1607  ;;  %v1598_v52 = vpop.permute.xlu0 %1597 }
  0xa4   :  { %v894_v59 = vsel %vm3570_vm9, %v893_v23, %v889_v55  ;;  %v928_v63 = vsub.f32 1.0, %v927_v58  ;;  %v913_v4 = vsub.f32 1.0, %v912_v61  ;;  %vm917_vm9 = vweird.f32 %v2483_v54 }
  0xa5   :  { %1767 = vperm.xlu1 %2322, %v894_v59   ;;  %v874_v1 = vsel %vm3634_vm3, %v2475_v27, %v870_v60  ;;  %2488 = vrcp.f32 %v3627_v29  ;;  %v945_v7 = vadd.f32 %v2479_v38, %v944_v35  ;;  %v923_v8 = vor.u32 1.1754944e-38, %v922_v42  ;;  %v1653_v27 = vpop.permute.xlu2 %1652  ;;  %v58_v42 = vld [vmem:[%s5560_s0 + $0x178] sm:$0xff] }
  0xa6   :  { %v2485_v5 = vpop.eup %2484  ;;  %v879_v6 = vsel %vm3599_vm13, %v878_v31, %v874_v1  ;;  %v929_v36 = vmul.f32 %v2481_v51, %v928_v63  ;;  %v914_v11 = vmul.f32 %v2483_v54, %v913_v4  ;;  %vm991_vm14 = vweird.f32 %v3617_v43  ;;  %vm3677_vm13 = vmor %vm916_vm7, %vm917_vm9  ;;  %v1473_v31 = vld [vmem:[%s5561_s1 + $0xb0] sm:$0xff] }
  0xa7   :  { %v3658_v9 = vpop.eup %2486  ;;  %1762 = vperm.xlu0 %2321, %v879_v6   ;;  %v995_v2 = vand.u32 2147483647, %v3617_v43  ;;  %v997_v13 = vand.u32 2147483648, %v3617_v43  ;;  %v949_v18 = vsel %vm3651_vm11, %v2479_v38, %v945_v7  ;;  %vm976_vm0 = vweird.f32 %v3627_v29 }
  0xa8   :  { %v930_v47 = vadd.f32 %v2481_v51, %v929_v36  ;;  %v987_v20 = vmul.f32 %v3658_v9, %v3617_v43  ;;  %v954_v22 = vsel %vm3604_vm15, %v953_v3, %v949_v18  ;;  %v915_v23 = vadd.f32 %v2483_v54, %v914_v11  ;;  %v1456_v43 = vld [vmem:[%s5561_s1 + $0x28] sm:$0xff] }
  0xa9   :  { %vm992_vm6 = vweird.f32 %v3658_v9  ;;  %v982_v16 = vand.u32 2147483648, %v3627_v29  ;;  %1787 = vperm.xlu2 %2323, %v954_v22   ;;  %v3693_v24 = vadd.f32 1.0, %v2485_v5  ;;  %v1971_v25 = vmul.f32 %v1638_v48, %v1467_v12 }
  0xaa   :  { %v934_v50 = vsel %vm3662_vm12, %v2481_v51, %v930_v47  ;;  %v988_v15 = vsub.f32 1.0, %v987_v20  ;;  %v919_v14 = vsel %vm3677_vm13, %v2483_v54, %v915_v23  ;;  %v1972_v19 = vmul.f32 %v1638_v48, %v1468_v53  ;;  %vm3725_vm1 = vmor %vm991_vm14, %vm992_vm6  ;;  %v1451_v48 = vld [vmem:[%s5561_s1] sm:$0xff]  ;;  %v1452_v51 = vld [vmem:[%s5561_s1 + $0x8] sm:$0xff] }
  0xab   :  { %v3695_v28 = vpop.eup %2488  ;;  %v939_v30 = vsel %vm3620_vm2, %v3615_v40, %v934_v50  ;;  %2490 = vpow2.f32 %v3578_v17  ;;  %v924_v32 = vsel %vm3643_vm10, %v923_v8, %v919_v14  ;;  %vm3709_vm15 = vcmp.eq.f32.partialorder %v995_v2, 8.507059e+37  ;;  %2116 = vst [vmem:[%s5562_s2 + $0x80] sm:$0xff] %v1971_v25  ;;  %v1474_v17 = vld [vmem:[%s5561_s1 + $0xb8] sm:$0xff]  ;;  %v1455_v40 = vld [vmem:[%s5561_s1 + $0x20] sm:$0xff]  ;;  %v61_v20 = vld [vmem:[%s5560_s0 + $0x190] sm:$0xff]  ;;  %v1603_v35 = vpop.permute.xlu0 %1602 }
  0xac   :  { %v989_v33 = vmul.f32 %v3658_v9, %v988_v15  ;;  %v972_v3 = vmul.f32 %v3695_v28, %v3627_v29  ;;  %v998_v34 = vor.u32 1.1754944e-38, %v997_v13  ;;  %vm977_vm2 = vweird.f32 %v3695_v28  ;;  %2117 = vst.msk [vmem:[%s5562_s2 + $0x88] sm:$0xff] %vm2100_vm4, %v1972_v19  ;;  %v1479_v2 = vld [vmem:[%s5561_s1 + $0xe0] sm:$0xff] }
  0xad   :  { %1782 = vperm.xlu1 %2322, %v939_v30   ;;  %v980_v39 = vand.u32 2147483647, %v3627_v29  ;;  %2492 = vrcp.f32 %v3693_v24  ;;  %v1977_v46 = vmul.f32 %v1653_v27, %v1473_v31  ;;  %v983_v54 = vor.u32 1.1754944e-38, %v982_v16  ;;  %vm3773_vm3 = vmor %vm976_vm0, %vm977_vm2  ;;  %v1668_v13 = vpop.permute.xlu2 %1667 }
  0xae   :  { %v990_v45 = vadd.f32 %v3658_v9, %v989_v33  ;;  %v973_v26 = vsub.f32 1.0, %v972_v3  ;;  %2494 = vpow2.f32 %v3586_v21  ;;  %v1978_v55 = vmul.f32 %v1653_v27, %v1474_v17  ;;  %v57_v21 = vld [vmem:[%s5560_s0 + $0x170] sm:$0xff] }
  0xaf   :  { %1777 = vperm.xlu0 %2321, %v924_v32   ;;  %2496 = vpow2.f32 %v3594_v0  ;;  %2122 = vst [vmem:[%s5562_s2 + $0xb0] sm:$0xff] %v1977_v46  ;;  %v1959_v58 = vmul.f32 %v1608_v44, %v1455_v40  ;;  %v1960_v59 = vmul.f32 %v1608_v44, %v1456_v43  ;;  %v56_v0 = vld [vmem:[%s5560_s0 + $0x168] sm:$0xff]  ;;  %v1955_v63 = vmul.f32 %v1598_v52, %v1451_v48  ;;  %v1613_v40 = vpop.permute.xlu1 %1612 }
  0xb0   :  { %v994_v56 = vsel %vm3725_vm1, %v3658_v9, %v990_v45  ;;  %v974_v41 = vmul.f32 %v3695_v28, %v973_v26  ;;  %2123 = vst.msk [vmem:[%s5562_s2 + $0xb8] sm:$0xff] %vm2100_vm4, %v1978_v55  ;;  %v1956_v62 = vmul.f32 %v1598_v52, %v1452_v51  ;;  %v2295_v1 = vmul.f32 -1.442695, %v58_v42  ;;  %v1465_v51 = vld [vmem:[%s5561_s1 + $0x70] sm:$0xff] }
  0xb1   :  { %v2491_v60 = vpop.eup %2490  ;;  %v999_v61 = vsel %vm3709_vm15, %v998_v34, %v994_v56  ;;  %vm3782_vm5 = vcmp.eq.f32.partialorder %v980_v39, 8.507059e+37  ;;  %2104 = vst [vmem:[%s5562_s2 + $0x20] sm:$0xff] %v1959_v58  ;;  %v2294_v5 = vmul.f32 -1.442695, %v57_v21  ;;  %v965_v7 = vand.u32 2147483647, %v3693_v24 }
  0xb2   :  { %1802 = vperm.xlu2 %2323, %v999_v61   ;;  %v975_v57 = vadd.f32 %v3695_v28, %v974_v41  ;;  %v3786_v29 = vadd.f32 1.0, %v2491_v60  ;;  %v967_v36 = vand.u32 2147483648, %v3693_v24  ;;  %2105 = vst.msk [vmem:[%s5562_s2 + $0x28] sm:$0xff] %vm2100_vm4, %v1960_v59  ;;  %2498 = vpow2.f32 %v2295_v1  ;;  %v1480_v34 = vld [vmem:[%s5561_s1 + $0xe8] sm:$0xff]  ;;  %v1457_v39 = vld [vmem:[%s5561_s1 + $0x30] sm:$0xff] }
  0xb3   :  { %v2493_v6 = vpop.eup %2492  ;;  %v2293_v8 = vmul.f32 -1.442695, %v56_v0  ;;  %vm961_vm7 = vweird.f32 %v3693_v24  ;;  %2099 = vst [vmem:[%s5562_s2] sm:$0xff] %v1955_v63  ;;  %vm3824_vm10 = vcmp.eq.f32.partialorder %v965_v7, 8.507059e+37  ;;  %v1983_v15 = vmul.f32 %v1668_v13, %v1479_v2  ;;  %v1453_v2 = vld [vmem:[%s5561_s1 + $0x10] sm:$0xff] }
  0xb4   :  { %v2495_v9 = vpop.eup %2494  ;;  %v979_v10 = vsel %vm3773_vm3, %v3695_v28, %v975_v57  ;;  %v957_v11 = vmul.f32 %v2493_v6, %v3693_v24  ;;  %2500 = vrcp.f32 %v3786_v29  ;;  %vm962_vm8 = vweird.f32 %v2493_v6  ;;  %2101 = vst.msk [vmem:[%s5562_s2 + $0x8] sm:$0xff] %vm2100_vm4, %v1956_v62 }
  0xb5   :  { %v2497_v12 = vpop.eup %2496  ;;  %v984_v18 = vsel %vm3782_vm5, %v983_v54, %v979_v10  ;;  %v1040_v47 = vand.u32 2147483647, %v3786_v29  ;;  %v1042_v49 = vand.u32 2147483648, %v3786_v29  ;;  %v3820_v22 = vadd.f32 1.0, %v2495_v9  ;;  %vm3835_vm9 = vmor %vm961_vm7, %vm962_vm8  ;;  %2128 = vst [vmem:[%s5562_s2 + $0xe0] sm:$0xff] %v1983_v15 }
  0xb6   :  { %1797 = vperm.xlu1 %2322, %v984_v18   ;;  %v958_v53 = vsub.f32 1.0, %v957_v11  ;;  %v3822_v23 = vadd.f32 1.0, %v2497_v12  ;;  %2502 = vpow2.f32 %v2294_v5  ;;  %v968_v50 = vor.u32 1.1754944e-38, %v967_v36  ;;  %v1458_v11 = vld [vmem:[%s5561_s1 + $0x38] sm:$0xff] }
  0xb7   :  { %2504 = vpow2.f32 %v2293_v8  ;;  %vm1036_vm11 = vweird.f32 %v3786_v29  ;;  %v3830_v27 = vmul.f32 -1.442695, %v61_v20  ;;  %vm3839_vm12 = vcmp.eq.f32.partialorder %v1040_v47, 8.507059e+37 }
  0xb8   :  { %v959_v25 = vmul.f32 %v2493_v6, %v958_v53  ;;  %2506 = vrcp.f32 %v3820_v22  ;;  %v2499_v28 = vpop.eup %2498  ;;  %v1025_v19 = vand.u32 2147483647, %v3820_v22  ;;  %v1027_v31 = vand.u32 2147483648, %v3820_v22 }
  0xb9   :  { %2508 = vrcp.f32 %v3822_v23  ;;  %v1043_v33 = vor.u32 1.1754944e-38, %v1042_v49  ;;  %vm1021_vm14 = vweird.f32 %v3820_v22  ;;  %v3850_v37 = vadd.f32 1.0, %v2499_v28 }
  0xba   :  { %v2501_v32 = vpop.eup %2500  ;;  %v960_v24 = vadd.f32 %v2493_v6, %v959_v25  ;;  %vm1006_vm13 = vweird.f32 %v3822_v23  ;;  %v1010_v17 = vand.u32 2147483647, %v3822_v23  ;;  %v1012_v38 = vand.u32 2147483648, %v3822_v23 }
  0xbb   :  { %v1032_v3 = vmul.f32 %v2501_v32, %v3786_v29  ;;  %vm1037_vm0 = vweird.f32 %v2501_v32  ;;  %v3864_v45 = vor.u32 1.1754944e-38, %v1027_v31  ;;  %2510 = vrcp.f32 %v3850_v37 }
  0xbc   :  { %v2503_v43 = vpop.eup %2502  ;;  %v964_v44 = vsel %vm3835_vm9, %v2493_v6, %v960_v24  ;;  %vm3869_vm6 = vcmp.eq.f32.partialorder %v1025_v19, 8.507059e+37  ;;  %v1085_v52 = vand.u32 2147483647, %v3850_v37  ;;  %v1087_v42 = vand.u32 2147483648, %v3850_v37  ;;  %vm3889_vm1 = vmor %vm1036_vm11, %vm1037_vm0  ;;  %v60_v24 = vld [vmem:[%s5560_s0 + $0x188] sm:$0xff] }
  0xbd   :  { %v2505_v26 = vpop.eup %2504  ;;  %v969_v46 = vsel %vm3824_vm10, %v968_v50, %v964_v44  ;;  %v1033_v48 = vsub.f32 1.0, %v1032_v3  ;;  %v3875_v55 = vadd.f32 1.0, %v2503_v43  ;;  %v1984_v56 = vmul.f32 %v1668_v13, %v1480_v34  ;;  %v1454_v13 = vld [vmem:[%s5561_s1 + $0x18] sm:$0xff]  ;;  %v1683_v43 = vpop.permute.xlu2 %1682 }
  0xbe   :  { %v2507_v54 = vpop.eup %2506  ;;  %1792 = vperm.xlu0 %2321, %v969_v46   ;;  %v3877_v21 = vadd.f32 1.0, %v2505_v26  ;;  %v1961_v41 = vmul.f32 %v1613_v40, %v1457_v39  ;;  %vm3882_vm15 = vcmp.eq.f32.partialorder %v1010_v17, 8.507059e+37  ;;  %v1013_v61 = vor.u32 1.1754944e-38, %v1012_v38  ;;  %v1633_v44 = vpop.permute.xlu1 %1632 }
  0xbf   :  { %v3879_v58 = vpop.eup %2508  ;;  %v1034_v59 = vmul.f32 %v2501_v32, %v1033_v48  ;;  %v1017_v0 = vmul.f32 %v2507_v54, %v3820_v22  ;;  %vm1022_vm2 = vweird.f32 %v2507_v54  ;;  %vm1081_vm3 = vweird.f32 %v3850_v37  ;;  %2129 = vst.msk [vmem:[%s5562_s2 + $0xe8] sm:$0xff] %vm2100_vm4, %v1984_v56  ;;  %v1486_v48 = vld [vmem:[%s5561_s1 + $0x118] sm:$0xff] }
  0xc0   :  { %v1002_v62 = vmul.f32 %v3879_v58, %v3822_v23  ;;  %2512 = vrcp.f32 %v3875_v55  ;;  %vm1007_vm5 = vweird.f32 %v3879_v58  ;;  %vm3902_vm7 = vcmp.eq.f32.partialorder %v1085_v52, 8.507059e+37  ;;  %2106 = vst [vmem:[%s5562_s2 + $0x30] sm:$0xff] %v1961_v41  ;;  %vm3935_vm10 = vmor %vm1021_vm14, %vm1022_vm2  ;;  %v1628_v52 = vpop.permute.xlu0 %1627  ;;  %v1466_v41 = vld [vmem:[%s5561_s1 + $0x78] sm:$0xff] }
  0xc1   :  { %v1035_v1 = vadd.f32 %v2501_v32, %v1034_v59  ;;  %v1018_v57 = vsub.f32 1.0, %v1017_v0  ;;  %v1070_v29 = vand.u32 2147483647, %v3875_v55  ;;  %v3910_v5 = vpop.eup %2510  ;;  %v3912_v7 = vor.u32 1.1754944e-38, %v1087_v42  ;;  %v64_v42 = vld [vmem:[%s5560_s0 + $0x1a8] sm:$0xff] }
  0xc2   :  { %v1003_v6 = vsub.f32 1.0, %v1002_v62  ;;  %v1072_v36 = vand.u32 2147483648, %v3875_v55  ;;  %2514 = vrcp.f32 %v3877_v21  ;;  %v1077_v10 = vmul.f32 %v3910_v5, %v3850_v37 }
  0xc3   :  { %v1039_v8 = vsel %vm3889_vm1, %v2501_v32, %v1035_v1  ;;  %v1019_v9 = vmul.f32 %v2507_v54, %v1018_v57  ;;  %vm1066_vm8 = vweird.f32 %v3875_v55  ;;  %vm1082_vm11 = vweird.f32 %v3910_v5 }
  0xc4   :  { %v1044_v12 = vsel %vm3839_vm12, %v1043_v33, %v1039_v8  ;;  %v1004_v47 = vmul.f32 %v3879_v58, %v1003_v6  ;;  %vm1051_vm9 = vweird.f32 %v3877_v21  ;;  %vm3946_vm12 = vmor %vm1006_vm13, %vm1007_vm5  ;;  %v1078_v53 = vsub.f32 1.0, %v1077_v10  ;;  %v59_v33 = vld [vmem:[%s5560_s0 + $0x180] sm:$0xff] }
  0xc5   :  { %1817 = vperm.xlu2 %2323, %v1044_v12   ;;  %v1020_v49 = vadd.f32 %v2507_v54, %v1019_v9  ;;  %vm3950_vm14 = vcmp.eq.f32.partialorder %v1070_v29, 8.507059e+37  ;;  %v3954_v16 = vor.u32 1.1754944e-38, %v1072_v36  ;;  %v1057_v50 = vand.u32 2147483648, %v3877_v21  ;;  %vm3984_vm13 = vmor %vm1081_vm3, %vm1082_vm11  ;;  %v62_v29 = vld [vmem:[%s5560_s0 + $0x198] sm:$0xff]  ;;  %v1698_v20 = vpop.permute.xlu2 %1697 }
  0xc6   :  { %v3957_v15 = vpop.eup %2512  ;;  %v1005_v25 = vadd.f32 %v3879_v58, %v1004_v47  ;;  %v1962_v28 = vmul.f32 %v1613_v40, %v1458_v11  ;;  %v1957_v30 = vmul.f32 %v1603_v35, %v1453_v2  ;;  %v1958_v23 = vmul.f32 %v1603_v35, %v1454_v13  ;;  %v1485_v40 = vld [vmem:[%s5561_s1 + $0x110] sm:$0xff]  ;;  %v63_v35 = vld [vmem:[%s5560_s0 + $0x1a0] sm:$0xff]  ;;  %v1648_v22 = vpop.permute.xlu1 %1647 }
  0xc7   :  { %v1024_v14 = vsel %vm3935_vm10, %v2507_v54, %v1020_v49  ;;  %v1079_v19 = vmul.f32 %v3910_v5, %v1078_v53  ;;  %v1062_v31 = vmul.f32 %v3957_v15, %v3875_v55  ;;  %v1055_v32 = vand.u32 2147483647, %v3877_v21  ;;  %v67_v13 = vld [vmem:[%s5560_s0 + $0x1c0] sm:$0xff]  ;;  %v1492_v49 = vld [vmem:[%s5561_s1 + $0x148] sm:$0xff] }
  0xc8   :  { %v3972_v3 = vpop.eup %2514  ;;  %v1029_v17 = vsel %vm3869_vm6, %v3864_v45, %v1024_v14  ;;  %v1009_v38 = vsel %vm3946_vm12, %v3879_v58, %v1005_v25  ;;  %vm1067_vm0 = vweird.f32 %v3957_v15  ;;  %v3989_v39 = vor.u32 1.1754944e-38, %v1057_v50  ;;  %2107 = vst.msk [vmem:[%s5562_s2 + $0x38] sm:$0xff] %vm2100_vm4, %v1962_v28  ;;  %v1491_v47 = vld [vmem:[%s5561_s1 + $0x140] sm:$0xff]  ;;  %v1472_v25 = vld [vmem:[%s5561_s1 + $0xa8] sm:$0xff]  ;;  %v1469_v28 = vld [vmem:[%s5561_s1 + $0x90] sm:$0xff] }
  0xc9   :  { %1812 = vperm.xlu1 %2322, %v1029_v17   ;;  %v1014_v37 = vsel %vm3882_vm15, %v1013_v61, %v1009_v38  ;;  %v1080_v45 = vadd.f32 %v3910_v5, %v1079_v19  ;;  %v1063_v26 = vsub.f32 1.0, %v1062_v31  ;;  %v1047_v46 = vmul.f32 %v3972_v3, %v3877_v21  ;;  %2102 = vst [vmem:[%s5562_s2 + $0x10] sm:$0xff] %v1957_v30  ;;  %v1463_v61 = vld [vmem:[%s5561_s1 + $0x60] sm:$0xff]  ;;  %vm4044_vm15 = vmor %vm1066_vm8, %vm1067_vm0  ;;  %v1643_v30 = vpop.permute.xlu0 %1642 }
  0xca   :  { %1807 = vperm.xlu0 %2321, %v1014_v37   ;;  %vm1052_vm6 = vweird.f32 %v3972_v3  ;;  %2103 = vst.msk [vmem:[%s5562_s2 + $0x18] sm:$0xff] %vm2100_vm4, %v1958_v23  ;;  %2516 = vpow2.f32 %v3830_v27  ;;  %v2297_v54 = vmul.f32 -1.442695, %v60_v24  ;;  %v2296_v56 = vmul.f32 -1.442695, %v59_v33  ;;  %v1464_v27 = vld [vmem:[%s5561_s1 + $0x68] sm:$0xff] }
  0xcb   :  { %v1084_v58 = vsel %vm3984_vm13, %v3910_v5, %v1080_v45  ;;  %v1064_v59 = vmul.f32 %v3957_v15, %v1063_v26  ;;  %v1048_v0 = vsub.f32 1.0, %v1047_v46  ;;  %v1989_v60 = vmul.f32 %v1683_v43, %v1485_v40  ;;  %vm4060_vm1 = vmor %vm1051_vm9, %vm1052_vm6  ;;  %v1471_v53 = vld [vmem:[%s5561_s1 + $0xa0] sm:$0xff] }
  0xcc   :  { %v1089_v63 = vsel %vm3902_vm7, %v3912_v7, %v1084_v58  ;;  %2518 = vpow2.f32 %v2297_v54  ;;  %v1990_v1 = vmul.f32 %v1683_v43, %v1486_v48  ;;  %v1969_v57 = vmul.f32 %v1633_v44, %v1465_v51 }
  0xcd   :  { %1832 = vperm.xlu2 %2323, %v1089_v63   ;;  %v1065_v5 = vadd.f32 %v3957_v15, %v1064_v59  ;;  %v1049_v4 = vmul.f32 %v3972_v3, %v1048_v0  ;;  %2520 = vpow2.f32 %v2296_v56  ;;  %2134 = vst [vmem:[%s5562_s2 + $0x110] sm:$0xff] %v1989_v60  ;;  %v1970_v55 = vmul.f32 %v1633_v44, %v1466_v41 }
  0xce   :  { %2135 = vst.msk [vmem:[%s5562_s2 + $0x118] sm:$0xff] %vm2100_vm4, %v1990_v1  ;;  %v1967_v7 = vmul.f32 %v1628_v52, %v1463_v61  ;;  %v1968_v36 = vmul.f32 %v1628_v52, %v1464_v27  ;;  %v2301_v8 = vmul.f32 -1.442695, %v64_v42  ;;  %v2300_v9 = vmul.f32 -1.442695, %v63_v35 }
  0xcf   :  { %v1069_v10 = vsel %vm4044_vm15, %v3957_v15, %v1065_v5  ;;  %v1050_v11 = vadd.f32 %v3972_v3, %v1049_v4  ;;  %vm4072_vm2 = vcmp.eq.f32.partialorder %v1055_v32, 8.507059e+37  ;;  %2114 = vst [vmem:[%s5562_s2 + $0x70] sm:$0xff] %v1969_v57  ;;  %v2299_v2 = vmul.f32 -1.442695, %v62_v29  ;;  %v1470_v32 = vld [vmem:[%s5561_s1 + $0x98] sm:$0xff] }
  0xd0   :  { %v2517_v12 = vpop.eup %2516  ;;  %v1074_v18 = vsel %vm3950_vm14, %v3954_v16, %v1069_v10  ;;  %2115 = vst.msk [vmem:[%s5562_s2 + $0x78] sm:$0xff] %vm2100_vm4, %v1970_v55  ;;  %2522 = vpow2.f32 %v2301_v8  ;;  %v1995_v15 = vmul.f32 %v1698_v20, %v1491_v47  ;;  %v1996_v19 = vmul.f32 %v1698_v20, %v1492_v49 }
  0xd1   :  { %1827 = vperm.xlu1 %2322, %v1074_v18   ;;  %v1054_v16 = vsel %vm4060_vm1, %v3972_v3, %v1050_v11  ;;  %v4101_v50 = vadd.f32 1.0, %v2517_v12  ;;  %2112 = vst [vmem:[%s5562_s2 + $0x60] sm:$0xff] %v1967_v7  ;;  %2524 = vpow2.f32 %v2300_v9  ;;  %v1975_v31 = vmul.f32 %v1648_v22, %v1471_v53  ;;  %v66_v3 = vld [vmem:[%s5560_s0 + $0x1b8] sm:$0xff]  ;;  %v1658_v27 = vpop.permute.xlu0 %1657 }
  0xd2   :  { %v2519_v23 = vpop.eup %2518  ;;  %v1059_v14 = vsel %vm4072_vm2, %v3989_v39, %v1054_v16  ;;  %2113 = vst.msk [vmem:[%s5562_s2 + $0x68] sm:$0xff] %vm2100_vm4, %v1968_v36  ;;  %2526 = vpow2.f32 %v2299_v2  ;;  %v2304_v33 = vmul.f32 -1.442695, %v67_v13  ;;  %v1976_v34 = vmul.f32 %v1648_v22, %v1472_v25 }
  0xd3   :  { %v2521_v24 = vpop.eup %2520  ;;  %1822 = vperm.xlu0 %2321, %v1059_v14   ;;  %2528 = vrcp.f32 %v4101_v50  ;;  %2140 = vst [vmem:[%s5562_s2 + $0x140] sm:$0xff] %v1995_v15  ;;  %v4129_v17 = vadd.f32 1.0, %v2519_v23  ;;  %v1973_v39 = vmul.f32 %v1643_v30, %v1469_v28  ;;  %v1130_v40 = vand.u32 2147483647, %v4101_v50 }
  0xd4   :  { %v4131_v38 = vadd.f32 1.0, %v2521_v24  ;;  %2141 = vst.msk [vmem:[%s5562_s2 + $0x148] sm:$0xff] %vm2100_vm4, %v1996_v19  ;;  %v1132_v43 = vand.u32 2147483648, %v4101_v50  ;;  %v1974_v44 = vmul.f32 %v1643_v30, %v1470_v32  ;;  %v2303_v26 = vmul.f32 -1.442695, %v66_v3 }
  0xd5   :  { %2120 = vst [vmem:[%s5562_s2 + $0xa0] sm:$0xff] %v1975_v31  ;;  %2530 = vrcp.f32 %v4129_v17  ;;  %v1117_v45 = vand.u32 2147483648, %v4129_v17  ;;  %vm1126_vm3 = vweird.f32 %v4101_v50  ;;  %v1115_v48 = vand.u32 2147483647, %v4129_v17 }
  0xd6   :  { %v2523_v37 = vpop.eup %2522  ;;  %2121 = vst.msk [vmem:[%s5562_s2 + $0xa8] sm:$0xff] %vm2100_vm4, %v1976_v34  ;;  %2532 = vrcp.f32 %v4131_v38  ;;  %v1102_v51 = vand.u32 2147483648, %v4131_v38  ;;  %v1100_v42 = vand.u32 2147483647, %v4131_v38  ;;  %vm4164_vm5 = vcmp.eq.f32.partialorder %v1130_v40, 8.507059e+37 }
  0xd7   :  { %v2525_v46 = vpop.eup %2524  ;;  %2118 = vst [vmem:[%s5562_s2 + $0x90] sm:$0xff] %v1973_v39  ;;  %v4156_v54 = vadd.f32 1.0, %v2523_v37  ;;  %2534 = vpow2.f32 %v2304_v33  ;;  %v1133_v59 = vor.u32 1.1754944e-38, %v1132_v43  ;;  %vm1111_vm7 = vweird.f32 %v4129_v17 }
  0xd8   :  { %v2527_v52 = vpop.eup %2526  ;;  %v4158_v56 = vadd.f32 1.0, %v2525_v46  ;;  %2119 = vst.msk [vmem:[%s5562_s2 + $0x98] sm:$0xff] %vm2100_vm4, %v1974_v44  ;;  %v1118_v61 = vor.u32 1.1754944e-38, %v1117_v45  ;;  %vm1096_vm8 = vweird.f32 %v4131_v38  ;;  %vm4174_vm10 = vcmp.eq.f32.partialorder %v1115_v48, 8.507059e+37  ;;  %v65_v45 = vld [vmem:[%s5560_s0 + $0x1b0] sm:$0xff]  ;;  %v71_v48 = vld [vmem:[%s5560_s0 + $0x1e0] sm:$0xff] }
  0xd9   :  { %v2529_v41 = vpop.eup %2528  ;;  %v4169_v0 = vadd.f32 1.0, %v2527_v52  ;;  %2536 = vrcp.f32 %v4156_v54  ;;  %v4178_v35 = vor.u32 1.1754944e-38, %v1102_v51  ;;  %v1175_v63 = vand.u32 2147483647, %v4156_v54 }
  0xda   :  { %v1122_v60 = vmul.f32 %v2529_v41, %v4101_v50  ;;  %v1177_v62 = vand.u32 2147483648, %v4156_v54  ;;  %2538 = vrcp.f32 %v4158_v56  ;;  %vm1127_vm11 = vweird.f32 %v2529_v41 }
  0xdb   :  { %v2531_v1 = vpop.eup %2530  ;;  %vm4183_vm9 = vcmp.eq.f32.partialorder %v1100_v42, 8.507059e+37  ;;  %v1162_v5 = vand.u32 2147483648, %v4158_v56  ;;  %2540 = vrcp.f32 %v4169_v0  ;;  %vm1171_vm12 = vweird.f32 %v4156_v54  ;;  %vm4196_vm0 = vmor %vm1126_vm3, %vm1127_vm11  ;;  %v1497_v42 = vld [vmem:[%s5561_s1 + $0x170] sm:$0xff] }
  0xdc   :  { %v1123_v57 = vsub.f32 1.0, %v1122_v60  ;;  %v2533_v4 = vpop.eup %2532  ;;  %v1107_v55 = vmul.f32 %v2531_v1, %v4129_v17  ;;  %v1160_v6 = vand.u32 2147483647, %v4158_v56  ;;  %2542 = vpow2.f32 %v2303_v26 }
  0xdd   :  { %v2535_v7 = vpop.eup %2534  ;;  %vm1112_vm14 = vweird.f32 %v2531_v1  ;;  %v1092_v8 = vmul.f32 %v2533_v4, %v4131_v38  ;;  %vm1156_vm13 = vweird.f32 %v4158_v56  ;;  %vm1097_vm6 = vweird.f32 %v2533_v4 }
  0xde   :  { %v1124_v36 = vmul.f32 %v2529_v41, %v1123_v57  ;;  %v1108_v10 = vsub.f32 1.0, %v1107_v55  ;;  %vm4200_vm15 = vcmp.eq.f32.partialorder %v1175_v63, 8.507059e+37  ;;  %v1178_v21 = vor.u32 1.1754944e-38, %v1177_v62  ;;  %vm4224_vm3 = vmor %vm1111_vm7, %vm1112_vm14 }
  0xdf   :  { %v2537_v2 = vpop.eup %2536  ;;  %v1093_v12 = vsub.f32 1.0, %v1092_v8  ;;  %v4204_v18 = vor.u32 1.1754944e-38, %v1162_v5  ;;  %vm1141_vm1 = vweird.f32 %v4169_v0  ;;  %vm4210_vm2 = vcmp.eq.f32.partialorder %v1160_v6, 8.507059e+37  ;;  %v1498_v5 = vld [vmem:[%s5561_s1 + $0x178] sm:$0xff]  ;;  %v1475_v8 = vld [vmem:[%s5561_s1 + $0xc0] sm:$0xff] }
  0xe0   :  { %v1125_v13 = vadd.f32 %v2529_v41, %v1124_v36  ;;  %v4207_v47 = vpop.eup %2538  ;;  %v1109_v49 = vmul.f32 %v2531_v1, %v1108_v10  ;;  %v1167_v20 = vmul.f32 %v2537_v2, %v4156_v54  ;;  %v1147_v22 = vand.u32 2147483648, %v4169_v0  ;;  %v1713_v54 = vpop.permute.xlu2 %1712  ;;  %v1478_v36 = vld [vmem:[%s5561_s1 + $0xd8] sm:$0xff] }
  0xe1   :  { %v4215_v16 = vadd.f32 1.0, %v2535_v7  ;;  %v4217_v50 = vpop.eup %2540  ;;  %v1094_v28 = vmul.f32 %v2533_v4, %v1093_v12  ;;  %vm1172_vm11 = vweird.f32 %v2537_v2  ;;  %v1152_v30 = vmul.f32 %v4207_v47, %v4158_v56  ;;  %v69_v12 = vld [vmem:[%s5560_s0 + $0x1d0] sm:$0xff] }
  0xe2   :  { %v1129_v15 = vsel %vm4196_vm0, %v2529_v41, %v1125_v13  ;;  %v2543_v23 = vpop.eup %2542  ;;  %v1110_v19 = vadd.f32 %v2531_v1, %v1109_v49  ;;  %vm4235_vm0 = vmor %vm1096_vm8, %vm1097_vm6  ;;  %v1168_v32 = vsub.f32 1.0, %v1167_v20  ;;  %v1137_v24 = vmul.f32 %v4217_v50, %v4169_v0  ;;  %v1663_v41 = vpop.permute.xlu1 %1662  ;;  %v70_v13 = vld [vmem:[%s5560_s0 + $0x1d8] sm:$0xff]  ;;  %v68_v20 = vld [vmem:[%s5560_s0 + $0x1c8] sm:$0xff] }
  0xe3   :  { %v1134_v14 = vsel %vm4164_vm5, %v1133_v59, %v1129_v15  ;;  %v1095_v33 = vadd.f32 %v2533_v4, %v1094_v28  ;;  %v1153_v3 = vsub.f32 1.0, %v1152_v30  ;;  %vm1157_vm7 = vweird.f32 %v4207_v47  ;;  %vm4253_vm5 = vmor %vm1171_vm12, %vm1172_vm11  ;;  %v1503_v30 = vld [vmem:[%s5561_s1 + $0x1a0] sm:$0xff] }
  0xe4   :  { %1847 = vperm.xlu2 %2323, %v1134_v14   ;;  %vm1142_vm14 = vweird.f32 %v4217_v50  ;;  %v1114_v17 = vsel %vm4224_vm3, %v2531_v1, %v1110_v19  ;;  %v1169_v34 = vmul.f32 %v2537_v2, %v1168_v32  ;;  %v1138_v38 = vsub.f32 1.0, %v1137_v24  ;;  %vm4269_vm8 = vmor %vm1156_vm13, %vm1157_vm7  ;;  %v73_v19 = vld [vmem:[%s5560_s0 + $0x1f0] sm:$0xff] }
  0xe5   :  { %2544 = vrcp.f32 %v4215_v16  ;;  %v1119_v39 = vsel %vm4174_vm10, %v1118_v61, %v1114_v17  ;;  %v1099_v40 = vsel %vm4235_vm0, %v2533_v4, %v1095_v33  ;;  %v1154_v44 = vmul.f32 %v4207_v47, %v1153_v3  ;;  %vm4283_vm10 = vmor %vm1141_vm1, %vm1142_vm14  ;;  %v1477_v4 = vld [vmem:[%s5561_s1 + $0xd0] sm:$0xff]  ;;  %v1504_v33 = vld [vmem:[%s5561_s1 + $0x1a8] sm:$0xff] }
  0xe6   :  { %v1145_v37 = vand.u32 2147483647, %v4169_v0  ;;  %1842 = vperm.xlu1 %2322, %v1119_v39   ;;  %v1104_v26 = vsel %vm4183_vm9, %v4178_v35, %v1099_v40  ;;  %v1170_v46 = vadd.f32 %v2537_v2, %v1169_v34  ;;  %v1139_v51 = vmul.f32 %v4217_v50, %v1138_v38  ;;  %v1483_v17 = vld [vmem:[%s5561_s1 + $0x100] sm:$0xff]  ;;  %v1484_v34 = vld [vmem:[%s5561_s1 + $0x108] sm:$0xff]  ;;  %v1673_v38 = vpop.permute.xlu0 %1672 }
  0xe7   :  { %v1220_v52 = vand.u32 2147483647, %v4215_v16  ;;  %1837 = vperm.xlu0 %2321, %v1104_v26   ;;  %v1155_v58 = vadd.f32 %v4207_v47, %v1154_v44  ;;  %v1148_v59 = vor.u32 1.1754944e-38, %v1147_v22  ;;  %v1222_v60 = vand.u32 2147483648, %v4215_v16 }
  0xe8   :  { %v4288_v61 = vadd.f32 1.0, %v2543_v23  ;;  %v1174_v35 = vsel %vm4253_vm5, %v2537_v2, %v1170_v46  ;;  %v1140_v63 = vadd.f32 %v4217_v50, %v1139_v51  ;;  %v2302_v62 = vmul.f32 -1.442695, %v65_v45  ;;  %v1476_v2 = vld [vmem:[%s5561_s1 + $0xc8] sm:$0xff]  ;;  %v1728_v23 = vpop.permute.xlu2 %1727  ;;  %v1482_v46 = vld [vmem:[%s5561_s1 + $0xf8] sm:$0xff] }
  0xe9   :  { %v2001_v1 = vmul.f32 %v1713_v54, %v1497_v42  ;;  %v1179_v0 = vsel %vm4200_vm15, %v1178_v21, %v1174_v35  ;;  %v1159_v57 = vsel %vm4269_vm8, %v4207_v47, %v1155_v58  ;;  %vm4298_vm9 = vcmp.eq.f32.partialorder %v1145_v37, 8.507059e+37  ;;  %v72_v37 = vld [vmem:[%s5560_s0 + $0x1e8] sm:$0xff] }
  0xea   :  { %2546 = vrcp.f32 %v4288_v61  ;;  %v1144_v6 = vsel %vm4283_vm10, %v4217_v50, %v1140_v63  ;;  %vm1216_vm12 = vweird.f32 %v4215_v16  ;;  %vm4315_vm13 = vcmp.eq.f32.partialorder %v1220_v52, 8.507059e+37  ;;  %v1678_v14 = vpop.permute.xlu1 %1677 }
  0xeb   :  { %v4309_v55 = vpop.eup %2544  ;;  %2146 = vst [vmem:[%s5562_s2 + $0x170] sm:$0xff] %v2001_v1  ;;  %v1164_v9 = vsel %vm4210_vm2, %v4204_v18, %v1159_v57  ;;  %v1223_v11 = vor.u32 1.1754944e-38, %v1222_v60  ;;  %v1205_v21 = vand.u32 2147483647, %v4288_v61  ;;  %v1149_v18 = vsel %vm4298_vm9, %v1148_v59, %v1144_v6 }
  0xec   :  { %1862 = vperm.xlu2 %2323, %v1179_v0   ;;  %v1212_v10 = vmul.f32 %v4309_v55, %v4215_v16  ;;  %2548 = vpow2.f32 %v2302_v62  ;;  %v2002_v47 = vmul.f32 %v1713_v54, %v1498_v5  ;;  %v1981_v49 = vmul.f32 %v1663_v41, %v1477_v4  ;;  %v1481_v16 = vld [vmem:[%s5561_s1 + $0xf0] sm:$0xff]  ;;  %v76_v62 = vld [vmem:[%s5560_s0 + $0x208] sm:$0xff]  ;;  %v75_v4 = vld [vmem:[%s5560_s0 + $0x200] sm:$0xff] }
  0xed   :  { %vm1217_vm6 = vweird.f32 %v4309_v55  ;;  %v1982_v22 = vmul.f32 %v1663_v41, %v1478_v36  ;;  %v1979_v50 = vmul.f32 %v1658_v27, %v1475_v8  ;;  %v1980_v15 = vmul.f32 %v1658_v27, %v1476_v2 }
  0xee   :  { %v1213_v53 = vsub.f32 1.0, %v1212_v10  ;;  %1857 = vperm.xlu1 %2322, %v1164_v9   ;;  %2147 = vst.msk [vmem:[%s5562_s2 + $0x178] sm:$0xff] %vm2100_vm4, %v2002_v47  ;;  %v2307_v25 = vmul.f32 -1.442695, %v70_v13  ;;  %v2306_v28 = vmul.f32 -1.442695, %v69_v12  ;;  %vm1201_vm15 = vweird.f32 %v4288_v61  ;;  %vm4379_vm1 = vmor %vm1216_vm12, %vm1217_vm6 }
  0xef   :  { %1852 = vperm.xlu0 %2321, %v1149_v18   ;;  %2126 = vst [vmem:[%s5562_s2 + $0xd0] sm:$0xff] %v1981_v49  ;;  %v2305_v24 = vmul.f32 -1.442695, %v68_v20  ;;  %v2007_v3 = vmul.f32 %v1728_v23, %v1503_v30  ;;  %v1207_v43 = vand.u32 2147483648, %v4288_v61  ;;  %v2008_v44 = vmul.f32 %v1728_v23, %v1504_v33 }
  0xf0   :  { %v4359_v31 = vpop.eup %2546  ;;  %v1214_v32 = vmul.f32 %v4309_v55, %v1213_v53  ;;  %2127 = vst.msk [vmem:[%s5562_s2 + $0xd8] sm:$0xff] %vm2100_vm4, %v1982_v22  ;;  %2550 = vpow2.f32 %v2307_v25  ;;  %v1987_v26 = vmul.f32 %v1678_v14, %v1483_v17  ;;  %v1988_v42 = vmul.f32 %v1678_v14, %v1484_v34  ;;  %v1743_v2 = vpop.permute.xlu2 %1742  ;;  %v1510_v14 = vld [vmem:[%s5561_s1 + $0x1d8] sm:$0xff] }
  0xf1   :  { %v1197_v40 = vmul.f32 %v4359_v31, %v4288_v61  ;;  %vm1202_vm2 = vweird.f32 %v4359_v31  ;;  %2124 = vst [vmem:[%s5562_s2 + $0xc0] sm:$0xff] %v1979_v50  ;;  %2552 = vpow2.f32 %v2306_v28  ;;  %v1985_v54 = vmul.f32 %v1673_v38, %v1481_v16 }
  0xf2   :  { %v1215_v45 = vadd.f32 %v4309_v55, %v1214_v32  ;;  %v2549_v51 = vpop.eup %2548  ;;  %2125 = vst.msk [vmem:[%s5562_s2 + $0xc8] sm:$0xff] %vm2100_vm4, %v1980_v15  ;;  %2554 = vpow2.f32 %v2305_v24  ;;  %v2310_v56 = vmul.f32 -1.442695, %v73_v19  ;;  %v2309_v59 = vmul.f32 -1.442695, %v72_v37  ;;  %vm4433_vm3 = vmor %vm1201_vm15, %vm1202_vm2  ;;  %v1489_v19 = vld [vmem:[%s5561_s1 + $0x130] sm:$0xff] }
  0xf3   :  { %v1198_v52 = vsub.f32 1.0, %v1197_v40  ;;  %v4414_v58 = vadd.f32 1.0, %v2549_v51  ;;  %2152 = vst [vmem:[%s5562_s2 + $0x1a0] sm:$0xff] %v2007_v3  ;;  %v1986_v35 = vmul.f32 %v1673_v38, %v1482_v46  ;;  %v2308_v63 = vmul.f32 -1.442695, %v71_v48 }
  0xf4   :  { %v1219_v41 = vsel %vm4379_vm1, %v4309_v55, %v1215_v45  ;;  %2153 = vst.msk [vmem:[%s5562_s2 + $0x1a8] sm:$0xff] %vm2100_vm4, %v2008_v44  ;;  %v1208_v0 = vor.u32 1.1754944e-38, %v1207_v43  ;;  %vm4444_vm11 = vcmp.eq.f32.partialorder %v1205_v21, 8.507059e+37  ;;  %v74_v55 = vld [vmem:[%s5560_s0 + $0x1f8] sm:$0xff]  ;;  %v4464_v36 = vmul.f32 -1.442695, %v76_v62 }
  0xf5   :  { %v1224_v60 = vsel %vm4315_vm13, %v1223_v11, %v1219_v41  ;;  %v1199_v27 = vmul.f32 %v4359_v31, %v1198_v52  ;;  %2556 = vrcp.f32 %v4414_v58  ;;  %2132 = vst [vmem:[%s5562_s2 + $0x100] sm:$0xff] %v1987_v26  ;;  %v1190_v61 = vand.u32 2147483647, %v4414_v58  ;;  %v1509_v21 = vld [vmem:[%s5561_s1 + $0x1d0] sm:$0xff] }
  0xf6   :  { %1877 = vperm.xlu2 %2323, %v1224_v60   ;;  %v2551_v57 = vpop.eup %2550  ;;  %2133 = vst.msk [vmem:[%s5562_s2 + $0x108] sm:$0xff] %vm2100_vm4, %v1988_v42  ;;  %2558 = vpow2.f32 %v2310_v56  ;;  %v1192_v10 = vand.u32 2147483648, %v4414_v58  ;;  %vm1186_vm0 = vweird.f32 %v4414_v58  ;;  %v4483_v12 = vmul.f32 -1.442695, %v75_v4  ;;  %v1688_v60 = vpop.permute.xlu0 %1687 }
  0xf7   :  { %v1200_v29 = vadd.f32 %v4359_v31, %v1199_v27  ;;  %v2553_v6 = vpop.eup %2552  ;;  %v4459_v7 = vadd.f32 1.0, %v2551_v57  ;;  %2130 = vst [vmem:[%s5562_s2 + $0xf0] sm:$0xff] %v1985_v54  ;;  %2560 = vpow2.f32 %v2309_v59  ;;  %v4488_v49 = vmul.f32 -1.442695, %v74_v55 }
  0xf8   :  { %v2555_v8 = vpop.eup %2554  ;;  %v4470_v11 = vadd.f32 1.0, %v2553_v6  ;;  %2131 = vst.msk [vmem:[%s5562_s2 + $0xf8] sm:$0xff] %vm2100_vm4, %v1986_v35  ;;  %2562 = vpow2.f32 %v2308_v63  ;;  %vm4490_vm7 = vcmp.eq.f32.partialorder %v1190_v61, 8.507059e+37  ;;  %v2013_v15 = vmul.f32 %v1743_v2, %v1509_v21  ;;  %v1758_v17 = vpop.permute.xlu2 %1757 }
  0xf9   :  { %v1204_v9 = vsel %vm4433_vm3, %v4359_v31, %v1200_v29  ;;  %2564 = vrcp.f32 %v4459_v7  ;;  %v1265_v18 = vand.u32 2147483647, %v4459_v7  ;;  %v1267_v47 = vand.u32 2147483648, %v4459_v7  ;;  %v4506_v31 = vpop.permute.xlu1 %1692 }
  0xfa   :  { %v1209_v13 = vsel %vm4444_vm11, %v1208_v0, %v1204_v9  ;;  %2566 = vrcp.f32 %v4470_v11  ;;  %v1250_v22 = vand.u32 2147483647, %v4470_v11  ;;  %v4495_v50 = vadd.f32 1.0, %v2555_v8  ;;  %2158 = vst [vmem:[%s5562_s2 + $0x1d0] sm:$0xff] %v2013_v15 }
  0xfb   :  { %1872 = vperm.xlu1 %2322, %v1209_v13   ;;  %v2557_v20 = vpop.eup %2556  ;;  %v1193_v30 = vor.u32 1.1754944e-38, %v1192_v10  ;;  %vm1261_vm14 = vweird.f32 %v4459_v7  ;;  %v1252_v23 = vand.u32 2147483648, %v4470_v11  ;;  %v4508_v24 = vor.u32 1.1754944e-38, %v1267_v47  ;;  %v1490_v47 = vld [vmem:[%s5561_s1 + $0x138] sm:$0xff] }
  0xfc   :  { %v2559_v25 = vpop.eup %2558  ;;  %v1182_v28 = vmul.f32 %v2557_v20, %v4414_v58  ;;  %vm1187_vm5 = vweird.f32 %v2557_v20  ;;  %vm1246_vm8 = vweird.f32 %v4470_v11  ;;  %2568 = vrcp.f32 %v4495_v50 }
  0xfd   :  { %v2561_v32 = vpop.eup %2560  ;;  %vm4515_vm10 = vcmp.eq.f32.partialorder %v1265_v18, 8.507059e+37  ;;  %v1235_v34 = vand.u32 2147483647, %v4495_v50  ;;  %v1237_v38 = vand.u32 2147483648, %v4495_v50  ;;  %v4521_v39 = vadd.f32 1.0, %v2559_v25  ;;  %vm4535_vm13 = vmor %vm1186_vm0, %vm1187_vm5 }
  0xfe   :  { %v2563_v33 = vpop.eup %2562  ;;  %v1183_v3 = vsub.f32 1.0, %v1182_v28  ;;  %vm4523_vm9 = vcmp.eq.f32.partialorder %v1250_v22, 8.507059e+37  ;;  %v4527_v44 = vadd.f32 1.0, %v2561_v32  ;;  %v2014_v16 = vmul.f32 %v1743_v2, %v1510_v14 }
  0xff   :  { %v2565_v40 = vpop.eup %2564  ;;  %v1993_v37 = vmul.f32 %v4506_v31, %v1489_v19  ;;  %v1253_v48 = vor.u32 1.1754944e-38, %v1252_v23  ;;  %vm1231_vm12 = vweird.f32 %v4495_v50  ;;  %2570 = vrcp.f32 %v4521_v39 }
 0x100   :  { %v2567_v45 = vpop.eup %2566  ;;  %v1184_v26 = vmul.f32 %v2557_v20, %v1183_v3  ;;  %v1257_v46 = vmul.f32 %v2565_v40, %v4459_v7  ;;  %vm1262_vm6 = vweird.f32 %v2565_v40  ;;  %v4541_v42 = vadd.f32 1.0, %v2563_v33  ;;  %2159 = vst.msk [vmem:[%s5562_s2 + $0x1d8] sm:$0xff] %vm2100_vm4, %v2014_v16  ;;  %v1515_v3 = vld [vmem:[%s5561_s1 + $0x200] sm:$0xff] }
 0x101   :  { %v1242_v52 = vmul.f32 %v2567_v45, %v4470_v11  ;;  %vm4547_vm15 = vcmp.eq.f32.partialorder %v1235_v34, 8.507059e+37  ;;  %v4551_v56 = vor.u32 1.1754944e-38, %v1237_v38  ;;  %v1310_v59 = vand.u32 2147483647, %v4521_v39  ;;  %2138 = vst [vmem:[%s5562_s2 + $0x130] sm:$0xff] %v1993_v37  ;;  %vm4571_vm2 = vmor %vm1261_vm14, %vm1262_vm6  ;;  %v1708_v34 = vpop.permute.xlu1 %1707  ;;  %v1516_v37 = vld [vmem:[%s5561_s1 + $0x208] sm:$0xff] }
 0x102   :  { %v1185_v54 = vadd.f32 %v2557_v20, %v1184_v26  ;;  %v1258_v41 = vsub.f32 1.0, %v1257_v46  ;;  %v4557_v27 = vpop.eup %2568  ;;  %vm1247_vm1 = vweird.f32 %v2567_v45  ;;  %v1312_v63 = vand.u32 2147483648, %v4521_v39  ;;  %v1703_v26 = vpop.permute.xlu0 %1702 }
 0x103   :  { %v1243_v35 = vsub.f32 1.0, %v1242_v52  ;;  %2572 = vrcp.f32 %v4527_v44  ;;  %v1227_v0 = vmul.f32 %v4557_v27, %v4495_v50  ;;  %v1295_v57 = vand.u32 2147483647, %v4527_v44  ;;  %vm4579_vm0 = vmor %vm1246_vm8, %vm1247_vm1 }
 0x104   :  { %v1189_v62 = vsel %vm4535_vm13, %v2557_v20, %v1185_v54  ;;  %v1259_v1 = vmul.f32 %v2565_v40, %v1258_v41  ;;  %vm1306_vm3 = vweird.f32 %v4521_v39  ;;  %vm1291_vm11 = vweird.f32 %v4527_v44  ;;  %v1487_v20 = vld [vmem:[%s5561_s1 + $0x120] sm:$0xff] }
 0x105   :  { %v1194_v29 = vsel %vm4490_vm7, %v1193_v30, %v1189_v62  ;;  %v1244_v4 = vmul.f32 %v2567_v45, %v1243_v35  ;;  %v1228_v61 = vsub.f32 1.0, %v1227_v0  ;;  %vm1232_vm7 = vweird.f32 %v4557_v27  ;;  %v4588_v8 = vpop.eup %2570  ;;  %v1488_v30 = vld [vmem:[%s5561_s1 + $0x128] sm:$0xff]  ;;  %v78_v62 = vld [vmem:[%s5560_s0 + $0x218] sm:$0xff] }
 0x106   :  { %1867 = vperm.xlu0 %2321, %v1194_v29   ;;  %v1260_v55 = vadd.f32 %v2565_v40, %v1259_v1  ;;  %vm4584_vm14 = vcmp.eq.f32.partialorder %v1310_v59, 8.507059e+37  ;;  %v4590_v10 = vor.u32 1.1754944e-38, %v1312_v63  ;;  %v1297_v21 = vand.u32 2147483648, %v4527_v44  ;;  %vm4621_vm13 = vmor %vm1231_vm12, %vm1232_vm7  ;;  %v79_v59 = vld [vmem:[%s5560_s0 + $0x220] sm:$0xff] }
 0x107   :  { %v1245_v9 = vadd.f32 %v2567_v45, %v1244_v4  ;;  %2574 = vrcp.f32 %v4541_v42  ;;  %v1229_v2 = vmul.f32 %v4557_v27, %v1228_v61  ;;  %v1302_v13 = vmul.f32 %v4588_v8, %v4521_v39 }
 0x108   :  { %v1264_v11 = vsel %vm4571_vm2, %v2565_v40, %v1260_v55  ;;  %vm4599_vm5 = vcmp.eq.f32.partialorder %v1295_v57, 8.507059e+37  ;;  %vm1276_vm8 = vweird.f32 %v4541_v42  ;;  %vm1307_vm6 = vweird.f32 %v4588_v8 }
 0x109   :  { %v4610_v53 = vpop.eup %2572  ;;  %v1269_v22 = vsel %vm4515_vm10, %v4508_v24, %v1264_v11  ;;  %v1249_v15 = vsel %vm4579_vm0, %v2567_v45, %v1245_v9  ;;  %v1280_v28 = vand.u32 2147483647, %v4541_v42  ;;  %v1230_v14 = vadd.f32 %v4557_v27, %v1229_v2  ;;  %v1496_v45 = vld [vmem:[%s5561_s1 + $0x168] sm:$0xff]  ;;  %v1521_v11 = vld [vmem:[%s5561_s1 + $0x230] sm:$0xff]  ;;  %v1522_v2 = vld [vmem:[%s5561_s1 + $0x238] sm:$0xff]  ;;  %v1723_v18 = vpop.permute.xlu1 %1722 }
 0x10a   :  { %1892 = vperm.xlu2 %2323, %v1269_v22   ;;  %v1254_v23 = vsel %vm4523_vm9, %v1253_v48, %v1249_v15  ;;  %v1303_v19 = vsub.f32 1.0, %v1302_v13  ;;  %v1287_v50 = vmul.f32 %v4610_v53, %v4527_v44  ;;  %vm1292_vm10 = vweird.f32 %v4610_v53  ;;  %vm4662_vm9 = vmor %vm1306_vm3, %vm1307_vm6  ;;  %v77_v44 = vld [vmem:[%s5560_s0 + $0x210] sm:$0xff]  ;;  %v1502_v22 = vld [vmem:[%s5561_s1 + $0x198] sm:$0xff] }
 0x10b   :  { %1887 = vperm.xlu1 %2322, %v1254_v23   ;;  %v1298_v32 = vor.u32 1.1754944e-38, %v1297_v21  ;;  %v1994_v24 = vmul.f32 %v4506_v31, %v1490_v47  ;;  %v1991_v33 = vmul.f32 %v1688_v60, %v1487_v20  ;;  %v1234_v38 = vsel %vm4621_vm13, %v4557_v27, %v1230_v14  ;;  %v1495_v31 = vld [vmem:[%s5561_s1 + $0x160] sm:$0xff]  ;;  %v1501_v13 = vld [vmem:[%s5561_s1 + $0x190] sm:$0xff]  ;;  %v82_v15 = vld [vmem:[%s5560_s0 + $0x238] sm:$0xff] }
 0x10c   :  { %v1304_v40 = vmul.f32 %v4588_v8, %v1303_v19  ;;  %v1288_v43 = vsub.f32 1.0, %v1287_v50  ;;  %v1992_v16 = vmul.f32 %v1688_v60, %v1488_v30  ;;  %v1239_v48 = vsel %vm4547_vm15, %v4551_v56, %v1234_v38  ;;  %v1493_v56 = vld [vmem:[%s5561_s1 + $0x150] sm:$0xff]  ;;  %vm4693_vm15 = vmor %vm1291_vm11, %vm1292_vm10  ;;  %v1499_v14 = vld [vmem:[%s5561_s1 + $0x180] sm:$0xff]  ;;  %v1718_v50 = vpop.permute.xlu0 %1717 }
 0x10d   :  { %v4653_v46 = vpop.eup %2574  ;;  %v1282_v52 = vand.u32 2147483648, %v4541_v42  ;;  %2139 = vst.msk [vmem:[%s5562_s2 + $0x138] sm:$0xff] %vm2100_vm4, %v1994_v24  ;;  %2576 = vpow2.f32 %v4464_v36  ;;  %v2019_v54 = vmul.f32 %v1758_v17, %v1515_v3  ;;  %v1494_v36 = vld [vmem:[%s5561_s1 + $0x158] sm:$0xff]  ;;  %v2020_v27 = vmul.f32 %v1758_v17, %v1516_v37  ;;  %v1500_v19 = vld [vmem:[%s5561_s1 + $0x188] sm:$0xff] }
 0x10e   :  { %1882 = vperm.xlu0 %2321, %v1239_v48   ;;  %v1305_v41 = vadd.f32 %v4588_v8, %v1304_v40  ;;  %v1289_v58 = vmul.f32 %v4610_v53, %v1288_v43  ;;  %v1272_v39 = vmul.f32 %v4653_v46, %v4541_v42  ;;  %vm1277_vm12 = vweird.f32 %v4653_v46  ;;  %2136 = vst [vmem:[%s5562_s2 + $0x120] sm:$0xff] %v1991_v33  ;;  %v1773_v42 = vpop.permute.xlu2 %1772 }
 0x10f   :  { %2137 = vst.msk [vmem:[%s5562_s2 + $0x128] sm:$0xff] %vm2100_vm4, %v1992_v16  ;;  %2578 = vpow2.f32 %v4483_v12  ;;  %v1999_v35 = vmul.f32 %v1708_v34, %v1495_v31  ;;  %v2000_v63 = vmul.f32 %v1708_v34, %v1496_v45  ;;  %v1997_v29 = vmul.f32 %v1703_v26, %v1493_v56  ;;  %vm4731_vm1 = vmor %vm1276_vm8, %vm1277_vm12  ;;  %v81_v56 = vld [vmem:[%s5560_s0 + $0x230] sm:$0xff] }
 0x110   :  { %v1309_v1 = vsel %vm4662_vm9, %v4588_v8, %v1305_v41  ;;  %v1290_v0 = vadd.f32 %v4610_v53, %v1289_v58  ;;  %v1273_v57 = vsub.f32 1.0, %v1272_v39  ;;  %2580 = vpow2.f32 %v4488_v49  ;;  %2164 = vst [vmem:[%s5562_s2 + $0x200] sm:$0xff] %v2019_v54 }
 0x111   :  { %v1314_v12 = vsel %vm4584_vm14, %v4590_v10, %v1309_v1  ;;  %2165 = vst.msk [vmem:[%s5562_s2 + $0x208] sm:$0xff] %vm2100_vm4, %v2020_v27  ;;  %v1998_v5 = vmul.f32 %v1703_v26, %v1494_v36  ;;  %v2316_v4 = vmul.f32 -1.442695, %v79_v59  ;;  %v2315_v61 = vmul.f32 -1.442695, %v78_v62 }
 0x112   :  { %1907 = vperm.xlu2 %2323, %v1314_v12   ;;  %v1294_v49 = vsel %vm4693_vm15, %v4610_v53, %v1290_v0  ;;  %v1274_v55 = vmul.f32 %v4653_v46, %v1273_v57  ;;  %2144 = vst [vmem:[%s5562_s2 + $0x160] sm:$0xff] %v1999_v35  ;;  %v2314_v7 = vmul.f32 -1.442695, %v77_v44  ;;  %vm4742_vm2 = vcmp.eq.f32.partialorder %v1280_v28, 8.507059e+37 }
 0x113   :  { %v2577_v8 = vpop.eup %2576  ;;  %v1299_v9 = vsel %vm4599_vm5, %v1298_v32, %v1294_v49  ;;  %v1283_v21 = vor.u32 1.1754944e-38, %v1282_v52  ;;  %2145 = vst.msk [vmem:[%s5562_s2 + $0x168] sm:$0xff] %vm2100_vm4, %v2000_v63  ;;  %2582 = vpow2.f32 %v2316_v4  ;;  %v2025_v53 = vmul.f32 %v1773_v42, %v1521_v11 }
 0x114   :  { %1902 = vperm.xlu1 %2322, %v1299_v9   ;;  %v1275_v47 = vadd.f32 %v4653_v46, %v1274_v55  ;;  %v4760_v20 = vadd.f32 1.0, %v2577_v8  ;;  %2142 = vst [vmem:[%s5562_s2 + $0x150] sm:$0xff] %v1997_v29  ;;  %2584 = vpow2.f32 %v2315_v61  ;;  %v2026_v28 = vmul.f32 %v1773_v42, %v1522_v2 }
 0x115   :  { %v2579_v25 = vpop.eup %2578  ;;  %2143 = vst.msk [vmem:[%s5562_s2 + $0x158] sm:$0xff] %vm2100_vm4, %v1998_v5  ;;  %2586 = vpow2.f32 %v2314_v7  ;;  %v2005_v30 = vmul.f32 %v1723_v18, %v1501_v13  ;;  %v2006_v23 = vmul.f32 %v1723_v18, %v1502_v22  ;;  %v2319_v34 = vmul.f32 -1.442695, %v82_v15  ;;  %v1514_v22 = vld [vmem:[%s5561_s1 + $0x1f8] sm:$0xff] }
 0x116   :  { %v2581_v32 = vpop.eup %2580  ;;  %v1279_v24 = vsel %vm4731_vm1, %v4653_v46, %v1275_v47  ;;  %2588 = vrcp.f32 %v4760_v20  ;;  %2170 = vst [vmem:[%s5562_s2 + $0x230] sm:$0xff] %v2025_v53  ;;  %v4790_v3 = vadd.f32 1.0, %v2579_v25  ;;  %v1355_v38 = vand.u32 2147483647, %v4760_v20 }
 0x117   :  { %v1284_v33 = vsel %vm4742_vm2, %v1283_v21, %v1279_v24  ;;  %v4792_v17 = vadd.f32 1.0, %v2581_v32  ;;  %2171 = vst.msk [vmem:[%s5562_s2 + $0x238] sm:$0xff] %vm2100_vm4, %v2026_v28  ;;  %v1357_v40 = vand.u32 2147483648, %v4760_v20  ;;  %v2003_v43 = vmul.f32 %v1718_v50, %v1499_v14  ;;  %v1511_v14 = vld [vmem:[%s5561_s1 + $0x1e0] sm:$0xff] }
 0x118   :  { %1897 = vperm.xlu0 %2321, %v1284_v33   ;;  %2150 = vst [vmem:[%s5562_s2 + $0x190] sm:$0xff] %v2005_v30  ;;  %v2004_v16 = vmul.f32 %v1718_v50, %v1500_v19  ;;  %2590 = vrcp.f32 %v4790_v3  ;;  %vm1351_vm3 = vweird.f32 %v4760_v20  ;;  %v1340_v45 = vand.u32 2147483647, %v4790_v3 }
 0x119   :  { %v2583_v37 = vpop.eup %2582  ;;  %2151 = vst.msk [vmem:[%s5562_s2 + $0x198] sm:$0xff] %vm2100_vm4, %v2006_v23  ;;  %v1342_v26 = vand.u32 2147483648, %v4790_v3  ;;  %2592 = vrcp.f32 %v4792_v17  ;;  %v1325_v48 = vand.u32 2147483647, %v4792_v17  ;;  %vm4824_vm11 = vcmp.eq.f32.partialorder %v1355_v38, 8.507059e+37  ;;  %v1788_v38 = vpop.permute.xlu2 %1787 }
 0x11a   :  { %v2585_v31 = vpop.eup %2584  ;;  %2148 = vst [vmem:[%s5562_s2 + $0x180] sm:$0xff] %v2003_v43  ;;  %v4816_v51 = vadd.f32 1.0, %v2583_v37  ;;  %2594 = vpow2.f32 %v2319_v34  ;;  %v1358_v58 = vor.u32 1.1754944e-38, %v1357_v40  ;;  %vm1336_vm0 = vweird.f32 %v4790_v3  ;;  %v1738_v40 = vpop.permute.xlu1 %1737  ;;  %v1519_v37 = vld [vmem:[%s5561_s1 + $0x220] sm:$0xff] }
 0x11b   :  { %v2587_v46 = vpop.eup %2586  ;;  %v4818_v52 = vadd.f32 1.0, %v2585_v31  ;;  %2149 = vst.msk [vmem:[%s5562_s2 + $0x188] sm:$0xff] %vm2100_vm4, %v2004_v16  ;;  %v1327_v39 = vand.u32 2147483648, %v4792_v17  ;;  %v4834_v59 = vor.u32 1.1754944e-38, %v1342_v26  ;;  %vm1321_vm7 = vweird.f32 %v4792_v17  ;;  %v1527_v26 = vld [vmem:[%s5561_s1 + $0x260] sm:$0xff] }
 0x11c   :  { %v2589_v54 = vpop.eup %2588  ;;  %2596 = vrcp.f32 %v4816_v51  ;;  %vm4838_vm14 = vcmp.eq.f32.partialorder %v1340_v45, 8.507059e+37  ;;  %v1400_v27 = vand.u32 2147483647, %v4816_v51  ;;  %v1402_v35 = vand.u32 2147483648, %v4816_v51 }
 0x11d   :  { %v1347_v36 = vmul.f32 %v2589_v54, %v4760_v20  ;;  %2598 = vrcp.f32 %v4818_v52  ;;  %v4845_v63 = vadd.f32 1.0, %v2587_v46  ;;  %vm1352_vm5 = vweird.f32 %v2589_v54  ;;  %v1528_v46 = vld [vmem:[%s5561_s1 + $0x268] sm:$0xff] }
 0x11e   :  { %v2591_v62 = vpop.eup %2590  ;;  %vm4847_vm8 = vcmp.eq.f32.partialorder %v1325_v48, 8.507059e+37  ;;  %v1385_v0 = vand.u32 2147483647, %v4818_v52  ;;  %v4852_v57 = vmul.f32 -1.442695, %v81_v56  ;;  %v1328_v5 = vor.u32 1.1754944e-38, %v1327_v39  ;;  %vm4861_vm9 = vmor %vm1351_vm3, %vm1352_vm5  ;;  %v1733_v48 = vpop.permute.xlu0 %1732 }
 0x11f   :  { %v1348_v44 = vsub.f32 1.0, %v1347_v36  ;;  %v2593_v12 = vpop.eup %2592  ;;  %v1332_v29 = vmul.f32 %v2591_v62, %v4790_v3  ;;  %vm1396_vm13 = vweird.f32 %v4816_v51  ;;  %vm1381_vm6 = vweird.f32 %v4818_v52 }
 0x120   :  { %v2595_v4 = vpop.eup %2594  ;;  %vm1337_vm10 = vweird.f32 %v2591_v62  ;;  %v1317_v55 = vmul.f32 %v2593_v12, %v4792_v17  ;;  %v1387_v6 = vand.u32 2147483648, %v4818_v52  ;;  %vm4865_vm12 = vcmp.eq.f32.partialorder %v1400_v27, 8.507059e+37  ;;  %v80_v17 = vld [vmem:[%s5560_s0 + $0x228] sm:$0xff] }
 0x121   :  { %v1349_v49 = vmul.f32 %v2589_v54, %v1348_v44  ;;  %v1333_v7 = vsub.f32 1.0, %v1332_v29  ;;  %v1403_v9 = vor.u32 1.1754944e-38, %v1402_v35  ;;  %2600 = vrcp.f32 %v4845_v63  ;;  %vm4883_vm2 = vmor %vm1336_vm0, %vm1337_vm10  ;;  %v1507_v35 = vld [vmem:[%s5561_s1 + $0x1c0] sm:$0xff]  ;;  %v1506_v29 = vld [vmem:[%s5561_s1 + $0x1b8] sm:$0xff]  ;;  %v1803_v2 = vpop.permute.xlu2 %1802 }
 0x122   :  { %v2597_v10 = vpop.eup %2596  ;;  %v1318_v11 = vsub.f32 1.0, %v1317_v55  ;;  %vm1322_vm15 = vweird.f32 %v2593_v12  ;;  %vm4870_vm1 = vcmp.eq.f32.partialorder %v1385_v0, 8.507059e+37  ;;  %v1370_v47 = vand.u32 2147483647, %v4845_v63 }
 0x123   :  { %v1350_v21 = vadd.f32 %v2589_v54, %v1349_v49  ;;  %v2599_v42 = vpop.eup %2598  ;;  %v1334_v13 = vmul.f32 %v2591_v62, %v1333_v7  ;;  %v1392_v18 = vmul.f32 %v2597_v10, %v4816_v51  ;;  %v4876_v20 = vadd.f32 1.0, %v2595_v4  ;;  %vm4893_vm3 = vmor %vm1321_vm7, %vm1322_vm15 }
 0x124   :  { %v1319_v15 = vmul.f32 %v2593_v12, %v1318_v11  ;;  %v1377_v25 = vmul.f32 %v2599_v42, %v4818_v52  ;;  %v1372_v28 = vand.u32 2147483648, %v4845_v63  ;;  %vm1397_vm0 = vweird.f32 %v2597_v10 }
 0x125   :  { %v1354_v53 = vsel %vm4861_vm9, %v2589_v54, %v1350_v21  ;;  %v1335_v23 = vadd.f32 %v2591_v62, %v1334_v13  ;;  %v1393_v19 = vsub.f32 1.0, %v1392_v18  ;;  %vm1382_vm5 = vweird.f32 %v2599_v42  ;;  %vm4914_vm7 = vmor %vm1396_vm13, %vm1397_vm0  ;;  %v1753_v13 = vpop.permute.xlu1 %1752 }
 0x126   :  { %v1359_v30 = vsel %vm4824_vm11, %v1358_v58, %v1354_v53  ;;  %v1320_v50 = vadd.f32 %v2593_v12, %v1319_v15  ;;  %v1378_v32 = vsub.f32 1.0, %v1377_v25  ;;  %2602 = vrcp.f32 %v4876_v20  ;;  %v1748_v15 = vpop.permute.xlu0 %1747  ;;  %v1518_v58 = vld [vmem:[%s5561_s1 + $0x218] sm:$0xff] }
 0x127   :  { %1922 = vperm.xlu2 %2323, %v1359_v30   ;;  %v4898_v24 = vpop.eup %2600  ;;  %v1339_v33 = vsel %vm4883_vm2, %v2591_v62, %v1335_v23  ;;  %v1394_v3 = vmul.f32 %v2597_v10, %v1393_v19  ;;  %v1388_v34 = vor.u32 1.1754944e-38, %v1387_v6  ;;  %vm1366_vm11 = vweird.f32 %v4845_v63  ;;  %v1508_v62 = vld [vmem:[%s5561_s1 + $0x1c8] sm:$0xff]  ;;  %v1533_v6 = vld [vmem:[%s5561_s1 + $0x290] sm:$0xff]  ;;  %v1551_v19 = vld [vmem:[%s5561_s1 + $0x320] sm:$0xff] }
 0x128   :  { %v1344_v43 = vsel %vm4838_vm14, %v4834_v59, %v1339_v33  ;;  %v1324_v16 = vsel %vm4893_vm3, %v2593_v12, %v1320_v50  ;;  %v1379_v31 = vmul.f32 %v2599_v42, %v1378_v32  ;;  %v1362_v45 = vmul.f32 %v4898_v24, %v4845_v63  ;;  %vm4931_vm14 = vmor %vm1381_vm6, %vm1382_vm5  ;;  %v1505_v12 = vld [vmem:[%s5561_s1 + $0x1b0] sm:$0xff] }
 0x129   :  { %1917 = vperm.xlu1 %2322, %v1344_v43   ;;  %v1329_v51 = vsel %vm4847_vm8, %v1328_v5, %v1324_v16  ;;  %v1395_v54 = vadd.f32 %v2597_v10, %v1394_v3  ;;  %vm4935_vm13 = vcmp.eq.f32.partialorder %v1370_v47, 8.507059e+37  ;;  %v1373_v39 = vor.u32 1.1754944e-38, %v1372_v28  ;;  %v1539_v43 = vld [vmem:[%s5561_s1 + $0x2c0] sm:$0xff]  ;;  %v1540_v16 = vld [vmem:[%s5561_s1 + $0x2c8] sm:$0xff] }
 0x12a   :  { %1912 = vperm.xlu0 %2321, %v1329_v51   ;;  %v1380_v56 = vadd.f32 %v2599_v42, %v1379_v31  ;;  %v1363_v36 = vsub.f32 1.0, %v1362_v45  ;;  %vm1367_vm10 = vweird.f32 %v4898_v24  ;;  %2604 = vpow2.f32 %v4852_v57  ;;  %v1520_v45 = vld [vmem:[%s5561_s1 + $0x228] sm:$0xff] }
 0x12b   :  { %v1399_v59 = vsel %vm4914_vm7, %v2597_v10, %v1395_v54  ;;  %v2317_v52 = vmul.f32 -1.442695, %v80_v17  ;;  %v2031_v60 = vmul.f32 %v1788_v38, %v1527_v26  ;;  %v2032_v27 = vmul.f32 %v1788_v38, %v1528_v46  ;;  %vm4969_vm6 = vmor %vm1366_vm11, %vm1367_vm10  ;;  %v1818_v26 = vpop.permute.xlu2 %1817 }
 0x12c   :  { %v4949_v44 = vpop.eup %2602  ;;  %v1404_v1 = vsel %vm4865_vm12, %v1403_v9, %v1399_v59  ;;  %v1384_v0 = vsel %vm4931_vm14, %v2599_v42, %v1380_v56  ;;  %v1364_v57 = vmul.f32 %v4898_v24, %v1363_v36  ;;  %vm1441_vm8 = vweird.f32 %v4876_v20  ;;  %v1534_v9 = vld [vmem:[%s5561_s1 + $0x298] sm:$0xff]  ;;  %v1513_v42 = vld [vmem:[%s5561_s1 + $0x1f0] sm:$0xff] }
 0x12d   :  { %v1389_v5 = vsel %vm4870_vm1, %v1388_v34, %v1384_v0  ;;  %v1437_v49 = vmul.f32 %v4949_v44, %v4876_v20  ;;  %v1445_v55 = vand.u32 2147483647, %v4876_v20  ;;  %2606 = vpow2.f32 %v2317_v52  ;;  %2176 = vst [vmem:[%s5562_s2 + $0x260] sm:$0xff] %v2031_v60  ;;  %v1768_v46 = vpop.permute.xlu1 %1767  ;;  %v1545_v0 = vld [vmem:[%s5561_s1 + $0x2f0] sm:$0xff] }
 0x12e   :  { %v1365_v63 = vadd.f32 %v4898_v24, %v1364_v57  ;;  %v1447_v61 = vand.u32 2147483648, %v4876_v20  ;;  %2177 = vst.msk [vmem:[%s5562_s2 + $0x268] sm:$0xff] %vm2100_vm4, %v2032_v27  ;;  %v2011_v7 = vmul.f32 %v1738_v40, %v1507_v35  ;;  %v2012_v8 = vmul.f32 %v1738_v40, %v1508_v62  ;;  %v1546_v57 = vld [vmem:[%s5561_s1 + $0x2f8] sm:$0xff] }
 0x12f   :  { %1937 = vperm.xlu2 %2323, %v1404_v1   ;;  %v1438_v10 = vsub.f32 1.0, %v1437_v49  ;;  %vm1442_vm9 = vweird.f32 %v4949_v44  ;;  %v2009_v21 = vmul.f32 %v1733_v48, %v1505_v12  ;;  %v2010_v11 = vmul.f32 %v1733_v48, %v1506_v29  ;;  %v1517_v48 = vld [vmem:[%s5561_s1 + $0x210] sm:$0xff] }
 0x130   :  { %v2605_v18 = vpop.eup %2604  ;;  %v1369_v47 = vsel %vm4969_vm6, %v4898_v24, %v1365_v63  ;;  %2156 = vst [vmem:[%s5562_s2 + $0x1c0] sm:$0xff] %v2011_v7  ;;  %v2037_v53 = vmul.f32 %v1803_v2, %v1533_v6  ;;  %v2038_v23 = vmul.f32 %v1803_v2, %v1534_v9  ;;  %vm5020_vm12 = vmor %vm1441_vm8, %vm1442_vm9  ;;  %v1448_v50 = vor.u32 1.1754944e-38, %v1447_v61  ;;  %v1512_v24 = vld [vmem:[%s5561_s1 + $0x1e8] sm:$0xff]  ;;  %v1525_v12 = vld [vmem:[%s5561_s1 + $0x250] sm:$0xff] }
 0x131   :  { %1932 = vperm.xlu1 %2322, %v1389_v5   ;;  %v1374_v25 = vsel %vm4935_vm13, %v1373_v39, %v1369_v47  ;;  %v1439_v28 = vmul.f32 %v4949_v44, %v1438_v10  ;;  %v5007_v30 = vadd.f32 1.0, %v2605_v18  ;;  %2157 = vst.msk [vmem:[%s5562_s2 + $0x1c8] sm:$0xff] %vm2100_vm4, %v2012_v8  ;;  %v2017_v32 = vmul.f32 %v1753_v13, %v1513_v42  ;;  %v1763_v39 = vpop.permute.xlu0 %1762  ;;  %v1523_v9 = vld [vmem:[%s5561_s1 + $0x240] sm:$0xff]  ;;  %v1524_v42 = vld [vmem:[%s5561_s1 + $0x248] sm:$0xff] }
 0x132   :  { %1927 = vperm.xlu0 %2321, %v1374_v25   ;;  %2154 = vst [vmem:[%s5562_s2 + $0x1b0] sm:$0xff] %v2009_v21  ;;  %vm1446_vm15 = vcmp.eq.f32.partialorder %v1445_v55, 8.507059e+37  ;;  %v2018_v20 = vmul.f32 %v1753_v13, %v1514_v22  ;;  %v2015_v17 = vmul.f32 %v1748_v15, %v1511_v14  ;;  %v2016_v40 = vmul.f32 %v1748_v15, %v1512_v24  ;;  %v1526_v55 = vld [vmem:[%s5561_s1 + $0x258] sm:$0xff] }
 0x133   :  { %v2607_v33 = vpop.eup %2606  ;;  %v1440_v3 = vadd.f32 %v4949_v44, %v1439_v28  ;;  %2608 = vrcp.f32 %v5007_v30  ;;  %2155 = vst.msk [vmem:[%s5562_s2 + $0x1b8] sm:$0xff] %vm2100_vm4, %v2010_v11  ;;  %v2043_v51 = vmul.f32 %v1818_v26, %v1539_v43  ;;  %v2044_v54 = vmul.f32 %v1818_v26, %v1540_v16  ;;  %v1833_v7 = vpop.permute.xlu2 %1832  ;;  %v1530_v43 = vld [vmem:[%s5561_s1 + $0x278] sm:$0xff]  ;;  %v1557_v26 = vld [vmem:[%s5561_s1 + $0x350] sm:$0xff] }
 0x134   :  { %v5036_v34 = vadd.f32 1.0, %v2607_v33  ;;  %2182 = vst [vmem:[%s5562_s2 + $0x290] sm:$0xff] %v2037_v53  ;;  %v2023_v41 = vmul.f32 %v1768_v46, %v1519_v37  ;;  %v2024_v36 = vmul.f32 %v1768_v46, %v1520_v45  ;;  %v1430_v52 = vand.u32 2147483647, %v5007_v30  ;;  %v1532_v33 = vld [vmem:[%s5561_s1 + $0x288] sm:$0xff]  ;;  %v1558_v46 = vld [vmem:[%s5561_s1 + $0x358] sm:$0xff] }
 0x135   :  { %v1444_v38 = vsel %vm5020_vm12, %v4949_v44, %v1440_v3  ;;  %2183 = vst.msk [vmem:[%s5562_s2 + $0x298] sm:$0xff] %vm2100_vm4, %v2038_v23  ;;  %v1432_v60 = vand.u32 2147483648, %v5007_v30  ;;  %v2021_v27 = vmul.f32 %v1763_v39, %v1517_v48  ;;  %v2022_v35 = vmul.f32 %v1763_v39, %v1518_v58  ;;  %v1783_v8 = vpop.permute.xlu1 %1782  ;;  %v1537_v48 = vld [vmem:[%s5561_s1 + $0x2b0] sm:$0xff]  ;;  %v1535_v58 = vld [vmem:[%s5561_s1 + $0x2a0] sm:$0xff] }
 0x136   :  { %v1449_v31 = vsel %vm1446_vm15, %v1448_v50, %v1444_v38  ;;  %2610 = vrcp.f32 %v5036_v34  ;;  %2162 = vst [vmem:[%s5562_s2 + $0x1f0] sm:$0xff] %v2017_v32  ;;  %vm1426_vm1 = vweird.f32 %v5007_v30  ;;  %vm5109_vm3 = vcmp.eq.f32.partialorder %v1430_v52, 8.507059e+37  ;;  %v1552_v50 = vld [vmem:[%s5561_s1 + $0x328] sm:$0xff]  ;;  %v1531_v32 = vld [vmem:[%s5561_s1 + $0x280] sm:$0xff] }
 0x137   :  { %1952 = vperm.xlu2 %2323, %v1449_v31   ;;  %2163 = vst.msk [vmem:[%s5562_s2 + $0x1f8] sm:$0xff] %vm2100_vm4, %v2018_v20  ;;  %v1433_v4 = vor.u32 1.1754944e-38, %v1432_v60  ;;  %v1417_v49 = vand.u32 2147483648, %v5036_v34  ;;  %vm1411_vm5 = vweird.f32 %v5036_v34  ;;  %v1415_v61 = vand.u32 2147483647, %v5036_v34 }
 0x138   :  { %2160 = vst [vmem:[%s5562_s2 + $0x1e0] sm:$0xff] %v2015_v17  ;;  %v2049_v21 = vmul.f32 %v1833_v7, %v1545_v0  ;;  %v2050_v11 = vmul.f32 %v1833_v7, %v1546_v57  ;;  %v2029_v2 = vmul.f32 %v1783_v8, %v1525_v12  ;;  %v2030_v47 = vmul.f32 %v1783_v8, %v1526_v55  ;;  %v1544_v0 = vld [vmem:[%s5561_s1 + $0x2e8] sm:$0xff]  ;;  %v1542_v55 = vld [vmem:[%s5561_s1 + $0x2d8] sm:$0xff]  ;;  %v1549_v8 = vld [vmem:[%s5561_s1 + $0x310] sm:$0xff] }
 0x139   :  { %v2609_v56 = vpop.eup %2608  ;;  %2161 = vst.msk [vmem:[%s5562_s2 + $0x1e8] sm:$0xff] %vm2100_vm4, %v2016_v40  ;;  %v1778_v13 = vpop.permute.xlu0 %1777  ;;  %v1418_v15 = vor.u32 1.1754944e-38, %v1417_v49  ;;  %vm1416_vm14 = vcmp.eq.f32.partialorder %v1415_v61, 8.507059e+37 }
 0x13a   :  { %v1422_v59 = vmul.f32 %v2609_v56, %v5007_v30  ;;  %2188 = vst [vmem:[%s5562_s2 + $0x2c0] sm:$0xff] %v2043_v51  ;;  %vm1427_vm2 = vweird.f32 %v2609_v56  ;;  %v2027_v25 = vmul.f32 %v1778_v13, %v1523_v9  ;;  %v2028_v23 = vmul.f32 %v1778_v13, %v1524_v42  ;;  %v1538_v51 = vld [vmem:[%s5561_s1 + $0x2b8] sm:$0xff] }
 0x13b   :  { %2189 = vst.msk [vmem:[%s5562_s2 + $0x2c8] sm:$0xff] %vm2100_vm4, %v2044_v54  ;;  %vm5120_vm0 = vmor %vm1426_vm1, %vm1427_vm2  ;;  %v1550_v9 = vld [vmem:[%s5561_s1 + $0x318] sm:$0xff] }
 0x13c   :  { %v2611_v62 = vpop.eup %2610  ;;  %v1423_v44 = vsub.f32 1.0, %v1422_v59  ;;  %2168 = vst [vmem:[%s5562_s2 + $0x220] sm:$0xff] %v2023_v41  ;;  %v1536_v59 = vld [vmem:[%s5561_s1 + $0x2a8] sm:$0xff] }
 0x13d   :  { %v1407_v1 = vmul.f32 %v2611_v62, %v5036_v34  ;;  %2169 = vst.msk [vmem:[%s5562_s2 + $0x228] sm:$0xff] %vm2100_vm4, %v2024_v36  ;;  %vm1412_vm11 = vweird.f32 %v2611_v62  ;;  %v1798_v20 = vpop.permute.xlu1 %1797  ;;  %v1529_v34 = vld [vmem:[%s5561_s1 + $0x270] sm:$0xff] }
 0x13e   :  { %v1424_v29 = vmul.f32 %v2609_v56, %v1423_v44  ;;  %2166 = vst [vmem:[%s5562_s2 + $0x210] sm:$0xff] %v2021_v27  ;;  %vm5141_vm7 = vmor %vm1411_vm5, %vm1412_vm11  ;;  %v1848_v3 = vpop.permute.xlu2 %1847  ;;  %v2035_v40 = vmul.f32 %v1798_v20, %v1531_v32  ;;  %v2036_v37 = vmul.f32 %v1798_v20, %v1532_v33  ;;  %v1564_v44 = vld [vmem:[%s5561_s1 + $0x388] sm:$0xff] }
 0x13f   :  { %v1408_v63 = vsub.f32 1.0, %v1407_v1  ;;  %2167 = vst.msk [vmem:[%s5562_s2 + $0x218] sm:$0xff] %vm2100_vm4, %v2022_v35  ;;  %v2055_v17 = vmul.f32 %v1848_v3, %v1551_v19  ;;  %v2056_v38 = vmul.f32 %v1848_v3, %v1552_v50  ;;  %v1543_v1 = vld [vmem:[%s5561_s1 + $0x2e0] sm:$0xff]  ;;  %v1554_v19 = vld [vmem:[%s5561_s1 + $0x338] sm:$0xff]  ;;  %v1576_v20 = vld [vmem:[%s5561_s1 + $0x3e8] sm:$0xff] }
 0x140   :  { %v1425_v10 = vadd.f32 %v2609_v56, %v1424_v29  ;;  %2194 = vst [vmem:[%s5562_s2 + $0x2f0] sm:$0xff] %v2049_v21  ;;  %v1541_v29 = vld [vmem:[%s5561_s1 + $0x2d0] sm:$0xff]  ;;  %v1548_v21 = vld [vmem:[%s5561_s1 + $0x308] sm:$0xff]  ;;  %v1575_v3 = vld [vmem:[%s5561_s1 + $0x3e0] sm:$0xff] }
 0x141   :  { %v1409_v18 = vmul.f32 %v2611_v62, %v1408_v63  ;;  %2195 = vst.msk [vmem:[%s5562_s2 + $0x2f8] sm:$0xff] %vm2100_vm4, %v2050_v11  ;;  %v1793_v16 = vpop.permute.xlu0 %1792 }
 0x142   :  { %v1429_v53 = vsel %vm5120_vm0, %v2609_v56, %v1425_v10  ;;  %2174 = vst [vmem:[%s5562_s2 + $0x250] sm:$0xff] %v2029_v2  ;;  %v2033_v31 = vmul.f32 %v1793_v16, %v1529_v34  ;;  %v2034_v45 = vmul.f32 %v1793_v16, %v1530_v43  ;;  %v1547_v10 = vld [vmem:[%s5561_s1 + $0x300] sm:$0xff]  ;;  %v1561_v16 = vld [vmem:[%s5561_s1 + $0x370] sm:$0xff] }
 0x143   :  { %v1434_v28 = vsel %vm5109_vm3, %v1433_v4, %v1429_v53  ;;  %v1410_v30 = vadd.f32 %v2611_v62, %v1409_v18  ;;  %2175 = vst.msk [vmem:[%s5562_s2 + $0x258] sm:$0xff] %vm2100_vm4, %v2030_v47  ;;  %v1569_v18 = vld [vmem:[%s5561_s1 + $0x3b0] sm:$0xff]  ;;  %v1570_v47 = vld [vmem:[%s5561_s1 + $0x3b8] sm:$0xff] }
 0x144   :  { %1947 = vperm.xlu1 %2322, %v1434_v28   ;;  %2172 = vst [vmem:[%s5562_s2 + $0x240] sm:$0xff] %v2027_v25 }
 0x145   :  { %v1414_v14 = vsel %vm5141_vm7, %v2611_v62, %v1410_v30  ;;  %2173 = vst.msk [vmem:[%s5562_s2 + $0x248] sm:$0xff] %vm2100_vm4, %v2028_v23  ;;  %v1813_v41 = vpop.permute.xlu1 %1812  ;;  %v1563_v62 = vld [vmem:[%s5561_s1 + $0x380] sm:$0xff]  ;;  %v1556_v23 = vld [vmem:[%s5561_s1 + $0x348] sm:$0xff] }
 0x146   :  { %v1419_v24 = vsel %vm1416_vm14, %v1418_v15, %v1414_v14  ;;  %2200 = vst [vmem:[%s5562_s2 + $0x320] sm:$0xff] %v2055_v17  ;;  %v1863_v54 = vpop.permute.xlu2 %1862  ;;  %v2041_v36 = vmul.f32 %v1813_v41, %v1537_v48  ;;  %v2042_v60 = vmul.f32 %v1813_v41, %v1538_v51  ;;  %v1555_v30 = vld [vmem:[%s5561_s1 + $0x340] sm:$0xff]  ;;  %v1553_v14 = vld [vmem:[%s5561_s1 + $0x330] sm:$0xff]  ;;  %v1560_v48 = vld [vmem:[%s5561_s1 + $0x368] sm:$0xff] }
 0x147   :  { %1942 = vperm.xlu0 %2321, %v1419_v24   ;;  %2201 = vst.msk [vmem:[%s5562_s2 + $0x328] sm:$0xff] %vm2100_vm4, %v2056_v38  ;;  %v2061_v39 = vmul.f32 %v1863_v54, %v1557_v26  ;;  %v2062_v56 = vmul.f32 %v1863_v54, %v1558_v46  ;;  %v1559_v46 = vld [vmem:[%s5561_s1 + $0x360] sm:$0xff] }
 0x148   :  { %2180 = vst [vmem:[%s5562_s2 + $0x280] sm:$0xff] %v2035_v40 }
 0x149   :  { %2181 = vst.msk [vmem:[%s5562_s2 + $0x288] sm:$0xff] %vm2100_vm4, %v2036_v37  ;;  %v1808_v52 = vpop.permute.xlu0 %1807  ;;  %v1562_v37 = vld [vmem:[%s5561_s1 + $0x378] sm:$0xff] }
 0x14a   :  { %2178 = vst [vmem:[%s5562_s2 + $0x270] sm:$0xff] %v2033_v31  ;;  %v2039_v27 = vmul.f32 %v1808_v52, %v1535_v58  ;;  %v2040_v35 = vmul.f32 %v1808_v52, %v1536_v59  ;;  %v1567_v58 = vld [vmem:[%s5561_s1 + $0x3a0] sm:$0xff]  ;;  %v1565_v52 = vld [vmem:[%s5561_s1 + $0x390] sm:$0xff] }
 0x14b   :  { %2179 = vst.msk [vmem:[%s5562_s2 + $0x278] sm:$0xff] %vm2100_vm4, %v2034_v45 }
 0x14c   :  { %2206 = vst [vmem:[%s5562_s2 + $0x350] sm:$0xff] %v2061_v39  ;;  %v1568_v39 = vld [vmem:[%s5561_s1 + $0x3a8] sm:$0xff] }
 0x14d   :  { %2207 = vst.msk [vmem:[%s5562_s2 + $0x358] sm:$0xff] %vm2100_vm4, %v2062_v56  ;;  %v1828_v12 = vpop.permute.xlu1 %1827 }
 0x14e   :  { %2186 = vst [vmem:[%s5562_s2 + $0x2b0] sm:$0xff] %v2041_v36  ;;  %v2047_v49 = vmul.f32 %v1828_v12, %v1543_v1  ;;  %v2048_v63 = vmul.f32 %v1828_v12, %v1544_v0 }
 0x14f   :  { %2187 = vst.msk [vmem:[%s5562_s2 + $0x2b8] sm:$0xff] %vm2100_vm4, %v2042_v60  ;;  %v1581_v60 = vld [vmem:[%s5561_s1 + $0x410] sm:$0xff] }
 0x150   :  { %2184 = vst [vmem:[%s5562_s2 + $0x2a0] sm:$0xff] %v2039_v27  ;;  %v1878_v57 = vpop.permute.xlu2 %1877  ;;  %v1582_v27 = vld [vmem:[%s5561_s1 + $0x418] sm:$0xff] }
 0x151   :  { %2185 = vst.msk [vmem:[%s5562_s2 + $0x2a8] sm:$0xff] %vm2100_vm4, %v2040_v35  ;;  %v2067_v5 = vmul.f32 %v1878_v57, %v1563_v62  ;;  %v2068_v4 = vmul.f32 %v1878_v57, %v1564_v44  ;;  %v1823_v6 = vpop.permute.xlu0 %1822  ;;  %v1566_v35 = vld [vmem:[%s5561_s1 + $0x398] sm:$0xff] }
 0x152   :  { %v2045_v61 = vmul.f32 %v1823_v6, %v1541_v29  ;;  %v2046_v7 = vmul.f32 %v1823_v6, %v1542_v55  ;;  %2192 = vst [vmem:[%s5562_s2 + $0x2e0] sm:$0xff] %v2047_v49  ;;  %v1573_v29 = vld [vmem:[%s5561_s1 + $0x3d0] sm:$0xff]  ;;  %v1587_v49 = vld [vmem:[%s5561_s1 + $0x440] sm:$0xff]  ;;  %v1588_v55 = vld [vmem:[%s5561_s1 + $0x448] sm:$0xff] }
 0x153   :  { %2212 = vst [vmem:[%s5562_s2 + $0x380] sm:$0xff] %v2067_v5  ;;  %v1574_v5 = vld [vmem:[%s5561_s1 + $0x3d8] sm:$0xff] }
 0x154   :  { %2213 = vst.msk [vmem:[%s5562_s2 + $0x388] sm:$0xff] %vm2100_vm4, %v2068_v4 }
 0x155   :  { %2193 = vst.msk [vmem:[%s5562_s2 + $0x2e8] sm:$0xff] %vm2100_vm4, %v2048_v63 }
 0x156   :  { %2190 = vst [vmem:[%s5562_s2 + $0x2d0] sm:$0xff] %v2045_v61  ;;  %v1571_v61 = vld [vmem:[%s5561_s1 + $0x3c0] sm:$0xff] }
 0x157   :  { %2191 = vst.msk [vmem:[%s5562_s2 + $0x2d8] sm:$0xff] %vm2100_vm4, %v2046_v7  ;;  %v1572_v7 = vld [vmem:[%s5561_s1 + $0x3c8] sm:$0xff] }
 0x158   :  { %v1843_v11 = vpop.permute.xlu1 %1842 }
 0x159   :  { %v2053_v2 = vmul.f32 %v1843_v11, %v1549_v8  ;;  %v2054_v42 = vmul.f32 %v1843_v11, %v1550_v9  ;;  %v1838_v13 = vpop.permute.xlu0 %1837 }
 0x15a   :  { %v2051_v53 = vmul.f32 %v1838_v13, %v1547_v10  ;;  %v2052_v22 = vmul.f32 %v1838_v13, %v1548_v21  ;;  %v1594_v13 = vld [vmem:[%s5561_s1 + $0x478] sm:$0xff] }
 0x15b   :  { %2198 = vst [vmem:[%s5562_s2 + $0x310] sm:$0xff] %v2053_v2 }
 0x15c   :  { %2199 = vst.msk [vmem:[%s5562_s2 + $0x318] sm:$0xff] %vm2100_vm4, %v2054_v42  ;;  %v1593_v42 = vld [vmem:[%s5561_s1 + $0x470] sm:$0xff] }
 0x15d   :  { %2196 = vst [vmem:[%s5562_s2 + $0x300] sm:$0xff] %v2051_v53 }
 0x15e   :  { %2197 = vst.msk [vmem:[%s5562_s2 + $0x308] sm:$0xff] %vm2100_vm4, %v2052_v22  ;;  %v1579_v22 = vld [vmem:[%s5561_s1 + $0x400] sm:$0xff] }
 0x160   :  { %v1858_v50 = vpop.permute.xlu1 %1857 }
 0x161   :  { %v2059_v32 = vmul.f32 %v1858_v50, %v1555_v30  ;;  %v2060_v24 = vmul.f32 %v1858_v50, %v1556_v23  ;;  %v1853_v33 = vpop.permute.xlu0 %1852 }
 0x162   :  { %v2057_v34 = vmul.f32 %v1853_v33, %v1553_v14  ;;  %v2058_v17 = vmul.f32 %v1853_v33, %v1554_v19  ;;  %v1586_v33 = vld [vmem:[%s5561_s1 + $0x438] sm:$0xff] }
 0x163   :  { %2204 = vst [vmem:[%s5562_s2 + $0x340] sm:$0xff] %v2059_v32 }
 0x164   :  { %v1893_v15 = vpop.permute.xlu2 %1892  ;;  %2205 = vst.msk [vmem:[%s5562_s2 + $0x348] sm:$0xff] %vm2100_vm4, %v2060_v24  ;;  %v1585_v24 = vld [vmem:[%s5561_s1 + $0x430] sm:$0xff] }
 0x165   :  { %v2073_v25 = vmul.f32 %v1893_v15, %v1569_v18  ;;  %v2074_v28 = vmul.f32 %v1893_v15, %v1570_v47  ;;  %2202 = vst [vmem:[%s5562_s2 + $0x330] sm:$0xff] %v2057_v34  ;;  %v1580_v15 = vld [vmem:[%s5561_s1 + $0x408] sm:$0xff] }
 0x166   :  { %2203 = vst.msk [vmem:[%s5562_s2 + $0x338] sm:$0xff] %vm2100_vm4, %v2058_v17 }
 0x167   :  { %2218 = vst [vmem:[%s5562_s2 + $0x3b0] sm:$0xff] %v2073_v25  ;;  %v1577_v25 = vld [vmem:[%s5561_s1 + $0x3f0] sm:$0xff] }
 0x168   :  { %2219 = vst.msk [vmem:[%s5562_s2 + $0x3b8] sm:$0xff] %vm2100_vm4, %v2074_v28  ;;  %v1578_v28 = vld [vmem:[%s5561_s1 + $0x3f8] sm:$0xff] }
 0x16c   :  { %v1908_v38 = vpop.permute.xlu2 %1907 }
 0x16d   :  { %v2079_v40 = vmul.f32 %v1908_v38, %v1575_v3  ;;  %v2080_v43 = vmul.f32 %v1908_v38, %v1576_v20  ;;  %v1873_v31 = vpop.permute.xlu1 %1872  ;;  %v1583_v3 = vld [vmem:[%s5561_s1 + $0x420] sm:$0xff]  ;;  %v1584_v20 = vld [vmem:[%s5561_s1 + $0x428] sm:$0xff] }
 0x16e   :  { %v2065_v45 = vmul.f32 %v1873_v31, %v1561_v16  ;;  %v2066_v26 = vmul.f32 %v1873_v31, %v1562_v37  ;;  %v1591_v37 = vld [vmem:[%s5561_s1 + $0x460] sm:$0xff]  ;;  %v1592_v31 = vld [vmem:[%s5561_s1 + $0x468] sm:$0xff] }
 0x16f   :  { %2224 = vst [vmem:[%s5562_s2 + $0x3e0] sm:$0xff] %v2079_v40 }
 0x170   :  { %2225 = vst.msk [vmem:[%s5562_s2 + $0x3e8] sm:$0xff] %vm2100_vm4, %v2080_v43 }
 0x171   :  { %2210 = vst [vmem:[%s5562_s2 + $0x370] sm:$0xff] %v2065_v45 }
 0x172   :  { %2211 = vst.msk [vmem:[%s5562_s2 + $0x378] sm:$0xff] %vm2100_vm4, %v2066_v26 }
 0x178   :  { %v1868_v51 = vpop.permute.xlu0 %1867 }
 0x179   :  { %v2063_v54 = vmul.f32 %v1868_v51, %v1559_v46  ;;  %v2064_v41 = vmul.f32 %v1868_v51, %v1560_v48  ;;  %v1589_v48 = vld [vmem:[%s5561_s1 + $0x450] sm:$0xff]  ;;  %v1590_v51 = vld [vmem:[%s5561_s1 + $0x458] sm:$0xff] }
 0x17b   :  { %2208 = vst [vmem:[%s5562_s2 + $0x360] sm:$0xff] %v2063_v54 }
 0x17c   :  { %2209 = vst.msk [vmem:[%s5562_s2 + $0x368] sm:$0xff] %vm2100_vm4, %v2064_v41 }
 0x17d   :  { %v1888_v56 = vpop.permute.xlu1 %1887 }
 0x17e   :  { %v2071_v36 = vmul.f32 %v1888_v56, %v1567_v58  ;;  %v2072_v59 = vmul.f32 %v1888_v56, %v1568_v39 }
 0x180   :  { %2216 = vst [vmem:[%s5562_s2 + $0x3a0] sm:$0xff] %v2071_v36  ;;  %v1883_v62 = vpop.permute.xlu0 %1882 }
 0x181   :  { %v1923_v44 = vpop.permute.xlu2 %1922  ;;  %2217 = vst.msk [vmem:[%s5562_s2 + $0x3a8] sm:$0xff] %vm2100_vm4, %v2072_v59  ;;  %v2069_v1 = vmul.f32 %v1883_v62, %v1565_v52  ;;  %v2070_v12 = vmul.f32 %v1883_v62, %v1566_v35 }
 0x182   :  { %v2085_v0 = vmul.f32 %v1923_v44, %v1581_v60  ;;  %v2086_v57 = vmul.f32 %v1923_v44, %v1582_v27 }
 0x183   :  { %2214 = vst [vmem:[%s5562_s2 + $0x390] sm:$0xff] %v2069_v1 }
 0x184   :  { %2230 = vst [vmem:[%s5562_s2 + $0x410] sm:$0xff] %v2085_v0 }
 0x185   :  { %2231 = vst.msk [vmem:[%s5562_s2 + $0x418] sm:$0xff] %vm2100_vm4, %v2086_v57 }
 0x186   :  { %2215 = vst.msk [vmem:[%s5562_s2 + $0x398] sm:$0xff] %vm2100_vm4, %v2070_v12  ;;  %v1903_v4 = vpop.permute.xlu1 %1902 }
 0x187   :  { %v2077_v6 = vmul.f32 %v1903_v4, %v1573_v29  ;;  %v2078_v63 = vmul.f32 %v1903_v4, %v1574_v5 }
 0x189   :  { %v1938_v8 = vpop.permute.xlu2 %1937  ;;  %2222 = vst [vmem:[%s5562_s2 + $0x3d0] sm:$0xff] %v2077_v6 }
 0x18a   :  { %v2091_v9 = vmul.f32 %v1938_v8, %v1587_v49  ;;  %v2092_v10 = vmul.f32 %v1938_v8, %v1588_v55  ;;  %2223 = vst.msk [vmem:[%s5562_s2 + $0x3d8] sm:$0xff] %vm2100_vm4, %v2078_v63  ;;  %v1898_v21 = vpop.permute.xlu0 %1897 }
 0x18b   :  { %v2075_v11 = vmul.f32 %v1898_v21, %v1571_v61  ;;  %v2076_v2 = vmul.f32 %v1898_v21, %v1572_v7 }
 0x18c   :  { %2236 = vst [vmem:[%s5562_s2 + $0x440] sm:$0xff] %v2091_v9 }
 0x18d   :  { %2237 = vst.msk [vmem:[%s5562_s2 + $0x448] sm:$0xff] %vm2100_vm4, %v2092_v10 }
 0x18e   :  { %2220 = vst [vmem:[%s5562_s2 + $0x3c0] sm:$0xff] %v2075_v11 }
 0x18f   :  { %2221 = vst.msk [vmem:[%s5562_s2 + $0x3c8] sm:$0xff] %vm2100_vm4, %v2076_v2 }
 0x191   :  { %v1953_v18 = vpop.permute.xlu2 %1952 }
 0x192   :  { %v2097_v47 = vmul.f32 %v1953_v18, %v1593_v42  ;;  %v2098_v53 = vmul.f32 %v1953_v18, %v1594_v13 }
 0x194   :  { %2242 = vst [vmem:[%s5562_s2 + $0x470] sm:$0xff] %v2097_v47 }
 0x195   :  { %2243 = vst.msk [vmem:[%s5562_s2 + $0x478] sm:$0xff] %vm2100_vm4, %v2098_v53 }
 0x19b   :  { %v1918_v30 = vpop.permute.xlu1 %1917 }
 0x19c   :  { %v2083_v23 = vmul.f32 %v1918_v30, %v1579_v22  ;;  %v2084_v14 = vmul.f32 %v1918_v30, %v1580_v15  ;;  %v1913_v19 = vpop.permute.xlu0 %1912 }
 0x19d   :  { %v2081_v50 = vmul.f32 %v1913_v19, %v1577_v25  ;;  %v2082_v32 = vmul.f32 %v1913_v19, %v1578_v28 }
 0x19e   :  { %2228 = vst [vmem:[%s5562_s2 + $0x400] sm:$0xff] %v2083_v23 }
 0x19f   :  { %2229 = vst.msk [vmem:[%s5562_s2 + $0x408] sm:$0xff] %vm2100_vm4, %v2084_v14 }
 0x1a0   :  { %2226 = vst [vmem:[%s5562_s2 + $0x3f0] sm:$0xff] %v2081_v50 }
 0x1a1   :  { %2227 = vst.msk [vmem:[%s5562_s2 + $0x3f8] sm:$0xff] %vm2100_vm4, %v2082_v32 }
 0x1a3   :  { %v1933_v34 = vpop.permute.xlu1 %1932 }
 0x1a4   :  { %v2089_v17 = vmul.f32 %v1933_v34, %v1585_v24  ;;  %v2090_v38 = vmul.f32 %v1933_v34, %v1586_v33  ;;  %v1928_v40 = vpop.permute.xlu0 %1927 }
 0x1a5   :  { %v2087_v43 = vmul.f32 %v1928_v40, %v1583_v3  ;;  %v2088_v16 = vmul.f32 %v1928_v40, %v1584_v20 }
 0x1a6   :  { %2234 = vst [vmem:[%s5562_s2 + $0x430] sm:$0xff] %v2089_v17 }
 0x1a7   :  { %2235 = vst.msk [vmem:[%s5562_s2 + $0x438] sm:$0xff] %vm2100_vm4, %v2090_v38 }
 0x1a8   :  { %2232 = vst [vmem:[%s5562_s2 + $0x420] sm:$0xff] %v2087_v43 }
 0x1a9   :  { %2233 = vst.msk [vmem:[%s5562_s2 + $0x428] sm:$0xff] %vm2100_vm4, %v2088_v16 }
 0x1b6   :  { %v1948_v45 = vpop.permute.xlu1 %1947 }
 0x1b7   :  { %v2095_v26 = vmul.f32 %v1948_v45, %v1591_v37  ;;  %v2096_v46 = vmul.f32 %v1948_v45, %v1592_v31 }
 0x1b9   :  { %2240 = vst [vmem:[%s5562_s2 + $0x460] sm:$0xff] %v2095_v26  ;;  %v1943_v54 = vpop.permute.xlu0 %1942 }
 0x1ba   :  { %2241 = vst.msk [vmem:[%s5562_s2 + $0x468] sm:$0xff] %vm2100_vm4, %v2096_v46  ;;  %v2093_v41 = vmul.f32 %v1943_v54, %v1589_v48  ;;  %v2094_v58 = vmul.f32 %v1943_v54, %v1590_v51 }
 0x1bc   :  { %2238 = vst [vmem:[%s5562_s2 + $0x450] sm:$0xff] %v2093_v41 }
 0x1bd   :  { %2239 = vst.msk [vmem:[%s5562_s2 + $0x458] sm:$0xff] %vm2100_vm4, %v2094_v58 }

</bundles_post_ra>
